<compile_context>
chip_gen: v7x
topology: tpu7x:2x2x1
jax: 0.10.0
libtpu: 0.0.40
codegen_flags: <defaults>
</compile_context>

<pallas_src>
import functools

import jax
import jax.numpy as jnp
from jax import lax
from jax.experimental import pallas as pl
from jax.experimental.pallas import tpu as pltpu


def _round_up(x: int, m: int) -> int:
    return (x + m - 1) // m * m


def _pick_tile(hw_pad: int) -> int:
    # Large lane-dense tiles (multiples of 128).  Double-buffered f32 working
    # set stays far under the scoped VMEM limit on v5e / v6e / v7x.
    for cand in (8192, 4096, 2048, 1024, 512, 256, 128):
        if hw_pad % cand == 0:
            return cand
    return 128


def _conv_stats_kernel(w_ref, b_ref, x_ref, y_ref, s1_ref, s2_ref, *,
                       c_in, c_out, tile, hw_valid, padded):
    """Pass 1: 1x1 conv (VPU multiply-accumulate) + per-channel sum/sumsq."""
    n = pl.program_id(0)
    t = pl.program_id(1)

    @pl.when(jnp.logical_and(n == 0, t == 0))
    def _init():
        s1_ref[...] = jnp.zeros_like(s1_ref)
        s2_ref[...] = jnp.zeros_like(s2_ref)

    x = x_ref[...]            # (C_in, TILE) f32
    w = w_ref[...]            # (C_out, C_in) f32, VMEM-resident
    b = b_ref[...]            # (C_out, 1)   f32, VMEM-resident

    # Unrolled VPU MAC over input channels (C_in is tiny -> skip the MXU).
    acc = w[:, 0:1] * x[0:1, :]                       # (C_out, TILE)
    for ci in range(1, c_in):
        acc = acc + w[:, ci:ci + 1] * x[ci:ci + 1, :]
    y = acc + b                                       # lane-broadcast bias
    y_ref[...] = y

    # Batch-norm statistics fused into the same pass so x crosses HBM once.
    if padded:
        lane = lax.broadcasted_iota(jnp.int32, (c_out, tile), 1)
        valid = (t * tile + lane) < hw_valid
        ys = jnp.where(valid, y, 0.0)
    else:
        ys = y
    s1_ref[...] += jnp.sum(ys, axis=1, keepdims=True)
    s2_ref[...] += jnp.sum(ys * ys, axis=1, keepdims=True)


def _affine_sigmoid_kernel(a_ref, c_ref, y_ref, o_ref):
    """Pass 2: out = sigmoid(a * y + c)  with the BN folded per-channel affine."""
    z = y_ref[...] * a_ref[...] + c_ref[...]
    o_ref[...] = 1.0 / (1.0 + jnp.exp(-z))


def conv_bn_sigmoid(x_nchw, conv_w, conv_b, *, eps=1e-5):
    n, c_in, h, w_sp = x_nchw.shape
    c_out = conv_w.shape[0]
    hw = h * w_sp
    hw_pad = _round_up(hw, 128)
    tile = _pick_tile(hw_pad)
    padded = hw_pad != hw

    # Free reshape (NO transpose): NCHW -> (N, C_in, H*W).
    x = x_nchw.reshape(n, c_in, hw).astype(jnp.float32)
    if padded:
        x = jnp.pad(x, ((0, 0), (0, 0), (0, hw_pad - hw)))

    w2 = conv_w.reshape(c_out, c_in).astype(jnp.float32)
    b2 = conv_b.reshape(c_out, 1).astype(jnp.float32)

    grid = (n, hw_pad // tile)

    kernel1 = functools.partial(
        _conv_stats_kernel, c_in=c_in, c_out=c_out, tile=tile,
        hw_valid=hw, padded=padded)

    y, s1, s2 = pl.pallas_call(
        kernel1,
        out_shape=(
            jax.ShapeDtypeStruct((n, c_out, hw_pad), jnp.float32),
            jax.ShapeDtypeStruct((c_out, 1), jnp.float32),
            jax.ShapeDtypeStruct((c_out, 1), jnp.float32),
        ),
        grid=grid,
        in_specs=[
            pl.BlockSpec((c_out, c_in), lambda i, j: (0, 0)),          # weight (resident)
            pl.BlockSpec((c_out, 1), lambda i, j: (0, 0)),             # bias   (resident)
            pl.BlockSpec((None, c_in, tile), lambda i, j: (i, 0, j)),  # x tiles
        ],
        out_specs=(
            pl.BlockSpec((None, c_out, tile), lambda i, j: (i, 0, j)),  # y tiles
            pl.BlockSpec((c_out, 1), lambda i, j: (0, 0)),              # sum   (accumulator)
            pl.BlockSpec((c_out, 1), lambda i, j: (0, 0)),              # sumsq (accumulator)
        ),
        compiler_params=pltpu.CompilerParams(
            dimension_semantics=("arbitrary", "arbitrary")),
    )(w2, b2, x)

    # Fold training-mode BatchNorm (batch stats, biased variance, eps=1e-5,
    # affine weight=1 / bias=0) into one per-channel scale & shift.
    count = jnp.float32(n * hw)
    mean = s1[:, 0] / count
    var = s2[:, 0] / count - mean * mean
    scale = lax.rsqrt(var + eps)
    shift = -mean * scale

    out = pl.pallas_call(
        _affine_sigmoid_kernel,
        out_shape=jax.ShapeDtypeStruct((n, c_out, hw_pad), jnp.float32),
        grid=grid,
        in_specs=[
            pl.BlockSpec((c_out, 1), lambda i, j: (0, 0)),              # scale (resident)
            pl.BlockSpec((c_out, 1), lambda i, j: (0, 0)),              # shift (resident)
            pl.BlockSpec((None, c_out, tile), lambda i, j: (i, 0, j)),  # y tiles
        ],
        out_specs=pl.BlockSpec((None, c_out, tile), lambda i, j: (i, 0, j)),
        compiler_params=pltpu.CompilerParams(
            dimension_semantics=("parallel", "parallel")),
    )(scale.reshape(c_out, 1), shift.reshape(c_out, 1), y)

    return out[:, :, :hw].reshape(n, c_out, h, w_sp)


def _reference(x_nchw, conv_w, conv_b, *, eps=1e-5):
    c_out, c_in = conv_w.shape[0], conv_w.shape[1]
    wmat = conv_w.reshape(c_out, c_in)
    y = jnp.sum(x_nchw[:, None, :, :, :] * wmat[None, :, :, None, None], axis=2)
    y = y + conv_b.reshape(1, c_out, 1, 1)
    mean = jnp.mean(y, axis=(0, 2, 3), keepdims=True)
    var = jnp.var(y, axis=(0, 2, 3), keepdims=True)   # biased, like PyTorch BN
    z = (y - mean) * lax.rsqrt(var + eps)
    return jax.nn.sigmoid(z)


if __name__ == "__main__":
    key = jax.random.PRNGKey(0)
    kx, kw, kb = jax.random.split(key, 3)
    # Shapes implied by the original module:
    #   x1 = torch.randn(1, 2, 128, 128); conv2 = Conv2d(2, 4, 1, padding=0)
    x1 = jax.random.normal(kx, (1, 2, 128, 128), dtype=jnp.float32)
    conv_w = jax.random.normal(kw, (4, 2, 1, 1), dtype=jnp.float32) * 0.5
    conv_b = jax.random.normal(kb, (4,), dtype=jnp.float32) * 0.1

    out = jax.block_until_ready(conv_bn_sigmoid(x1, conv_w, conv_b))
    ref = jax.block_until_ready(_reference(x1, conv_w, conv_b))

    assert out.shape == (1, 4, 128, 128), out.shape
    err = float(jnp.max(jnp.abs(out - ref)))
    assert err < 1e-3, f"max abs error vs reference: {err}"
    print("KERNEL_OK")
</pallas_src>

<mosaic_0001>
module attributes {stable_mosaic.version = 11 : i64} {
  func.func @_conv_stats_kernel(%arg0: i32, %arg1: i32, %arg2: memref<4x2xf32, #tpu.memory_space<vmem>>, %arg3: memref<4x1xf32, #tpu.memory_space<vmem>>, %arg4: memref<1x2x8192xf32, #tpu.memory_space<vmem>>, %arg5: memref<1x4x8192xf32, #tpu.memory_space<vmem>>, %arg6: memref<4x1xf32, #tpu.memory_space<vmem>>, %arg7: memref<4x1xf32, #tpu.memory_space<vmem>>) attributes {dimension_semantics = [#tpu.dimension_semantics<arbitrary>, #tpu.dimension_semantics<arbitrary>], iteration_bounds = array<i64: 1, 2>, scalar_prefetch = 0 : i64, scratch_operands = 0 : i64, tpu.core_type = #tpu.core_type<tc>, window_params = [{pipeline_mode = #tpu.pipeline_mode<synchronous>, transform_indices = @transform_0, window_bounds = array<i64: 4, 2>}, {pipeline_mode = #tpu.pipeline_mode<synchronous>, transform_indices = @transform_1, window_bounds = array<i64: 4, 1>}, {transform_indices = @transform_2, window_bounds = array<i64: 1, 2, 8192>}, {transform_indices = @transform_3, window_bounds = array<i64: 1, 4, 8192>}, {pipeline_mode = #tpu.pipeline_mode<synchronous>, transform_indices = @transform_4, window_bounds = array<i64: 4, 1>}, {pipeline_mode = #tpu.pipeline_mode<synchronous>, transform_indices = @transform_5, window_bounds = array<i64: 4, 1>}]} {
    %c0_i32 = arith.constant 0 : i32
    %0 = arith.cmpi eq, %arg0, %c0_i32 : i32
    %c0_i32_0 = arith.constant 0 : i32
    %1 = arith.cmpi eq, %arg1, %c0_i32_0 : i32
    %2 = arith.andi %0, %1 : i1
    %3 = arith.extui %2 : i1 to i32
    %c0_i32_1 = arith.constant 0 : i32
    %4 = arith.cmpi ne, %3, %c0_i32_1 : i32
    scf.if %4 {
      %cst_20 = arith.constant 0.000000e+00 : f32
      %36 = vector.broadcast %cst_20 : f32 to vector<4x1xf32>
      %c0_21 = arith.constant 0 : index
      %c0_22 = arith.constant 0 : index
      %37 = vector.load %arg6[%c0_21, %c0_22] : memref<4x1xf32, #tpu.memory_space<vmem>>, vector<4x1xf32>
      tpu.vector_store %arg6[%c0_21, %c0_22], %36 {strides = array<i32>} : memref<4x1xf32, #tpu.memory_space<vmem>>, vector<4x1xf32>,
      %cst_23 = arith.constant 0.000000e+00 : f32
      %38 = vector.broadcast %cst_23 : f32 to vector<4x1xf32>
      %c0_24 = arith.constant 0 : index
      %c0_25 = arith.constant 0 : index
      %39 = vector.load %arg7[%c0_24, %c0_25] : memref<4x1xf32, #tpu.memory_space<vmem>>, vector<4x1xf32>
      tpu.vector_store %arg7[%c0_24, %c0_25], %38 {strides = array<i32>} : memref<4x1xf32, #tpu.memory_space<vmem>>, vector<4x1xf32>,
    } else {
    }
    %c0 = arith.constant 0 : index
    %c0_2 = arith.constant 0 : index
    %c0_3 = arith.constant 0 : index
    %5 = vector.load %arg4[%c0, %c0_2, %c0_3] : memref<1x2x8192xf32, #tpu.memory_space<vmem>>, vector<1x2x8192xf32>
    %6 = vector.shape_cast %5 : vector<1x2x8192xf32> to vector<2x8192xf32>
    %c0_4 = arith.constant 0 : index
    %c0_5 = arith.constant 0 : index
    %7 = vector.load %arg2[%c0_4, %c0_5] : memref<4x2xf32, #tpu.memory_space<vmem>>, vector<4x2xf32>
    %c0_6 = arith.constant 0 : index
    %c0_7 = arith.constant 0 : index
    %8 = vector.load %arg3[%c0_6, %c0_7] : memref<4x1xf32, #tpu.memory_space<vmem>>, vector<4x1xf32>
    %9 = vector.extract_strided_slice %7 {offsets = [0, 0], sizes = [4, 1], strides = [1, 1]} : vector<4x2xf32> to vector<4x1xf32>
    %10 = vector.extract_strided_slice %6 {offsets = [0, 0], sizes = [1, 8192], strides = [1, 1]} : vector<2x8192xf32> to vector<1x8192xf32>
    %11 = vector.broadcast %9 : vector<4x1xf32> to vector<4x8192xf32>
    %12 = vector.broadcast %10 : vector<1x8192xf32> to vector<4x8192xf32>
    %13 = arith.mulf %11, %12 : vector<4x8192xf32>
    %14 = vector.extract_strided_slice %7 {offsets = [0, 1], sizes = [4, 1], strides = [1, 1]} : vector<4x2xf32> to vector<4x1xf32>
    %15 = vector.extract_strided_slice %6 {offsets = [1, 0], sizes = [1, 8192], strides = [1, 1]} : vector<2x8192xf32> to vector<1x8192xf32>
    %16 = vector.broadcast %14 : vector<4x1xf32> to vector<4x8192xf32>
    %17 = vector.broadcast %15 : vector<1x8192xf32> to vector<4x8192xf32>
    %18 = arith.mulf %16, %17 : vector<4x8192xf32>
    %19 = arith.addf %13, %18 : vector<4x8192xf32>
    %20 = vector.broadcast %8 : vector<4x1xf32> to vector<4x8192xf32>
    %21 = arith.addf %19, %20 : vector<4x8192xf32>
    %c0_8 = arith.constant 0 : index
    %c0_9 = arith.constant 0 : index
    %c0_10 = arith.constant 0 : index
    %22 = vector.load %arg5[%c0_8, %c0_9, %c0_10] : memref<1x4x8192xf32, #tpu.memory_space<vmem>>, vector<1x4x8192xf32>
    %23 = vector.shape_cast %22 : vector<1x4x8192xf32> to vector<4x8192xf32>
    %24 = vector.shape_cast %21 : vector<4x8192xf32> to vector<1x4x8192xf32>
    tpu.vector_store %arg5[%c0_8, %c0_9, %c0_10], %24 {strides = array<i32>} : memref<1x4x8192xf32, #tpu.memory_space<vmem>>, vector<1x4x8192xf32>,
    %c0_11 = arith.constant 0 : index
    %c0_12 = arith.constant 0 : index
    %25 = vector.load %arg6[%c0_11, %c0_12] : memref<4x1xf32, #tpu.memory_space<vmem>>, vector<4x1xf32>
    %cst = arith.constant dense<0.000000e+00> : vector<4xf32>
    %26 = vector.multi_reduction <add>, %21, %cst [1] : vector<4x8192xf32> to vector<4xf32>
    %27 = vector.shape_cast %26 : vector<4xf32> to vector<4x1xf32>
    %28 = arith.addf %25, %27 : vector<4x1xf32>
    %c0_13 = arith.constant 0 : index
    %c0_14 = arith.constant 0 : index
    %29 = vector.load %arg6[%c0_13, %c0_14] : memref<4x1xf32, #tpu.memory_space<vmem>>, vector<4x1xf32>
    tpu.vector_store %arg6[%c0_13, %c0_14], %28 {strides = array<i32>} : memref<4x1xf32, #tpu.memory_space<vmem>>, vector<4x1xf32>,
    %c0_15 = arith.constant 0 : index
    %c0_16 = arith.constant 0 : index
    %30 = vector.load %arg7[%c0_15, %c0_16] : memref<4x1xf32, #tpu.memory_space<vmem>>, vector<4x1xf32>
    %31 = arith.mulf %21, %21 : vector<4x8192xf32>
    %cst_17 = arith.constant dense<0.000000e+00> : vector<4xf32>
    %32 = vector.multi_reduction <add>, %31, %cst_17 [1] : vector<4x8192xf32> to vector<4xf32>
    %33 = vector.shape_cast %32 : vector<4xf32> to vector<4x1xf32>
    %34 = arith.addf %30, %33 : vector<4x1xf32>
    %c0_18 = arith.constant 0 : index
    %c0_19 = arith.constant 0 : index
    %35 = vector.load %arg7[%c0_18, %c0_19] : memref<4x1xf32, #tpu.memory_space<vmem>>, vector<4x1xf32>
    tpu.vector_store %arg7[%c0_18, %c0_19], %34 {strides = array<i32>} : memref<4x1xf32, #tpu.memory_space<vmem>>, vector<4x1xf32>,
    return
  }
  func.func @transform_0(%arg0: i32, %arg1: i32) -> (i32, i32) {
    %c0_i32 = arith.constant 0 : i32
    %c0_i32_0 = arith.constant 0 : i32
    %c0_i32_1 = arith.constant 0 : i32
    return %c0_i32, %c0_i32_0 : i32, i32
  }
  func.func @transform_1(%arg0: i32, %arg1: i32) -> (i32, i32) {
    %c0_i32 = arith.constant 0 : i32
    %c0_i32_0 = arith.constant 0 : i32
    %c0_i32_1 = arith.constant 0 : i32
    return %c0_i32, %c0_i32_0 : i32, i32
  }
  func.func @transform_2(%arg0: i32, %arg1: i32) -> (i32, i32, i32) {
    %c0_i32 = arith.constant 0 : i32
    %c0_i32_0 = arith.constant 0 : i32
    return %arg0, %c0_i32, %arg1 : i32, i32, i32
  }
  func.func @transform_3(%arg0: i32, %arg1: i32) -> (i32, i32, i32) {
    %c0_i32 = arith.constant 0 : i32
    %c0_i32_0 = arith.constant 0 : i32
    return %arg0, %c0_i32, %arg1 : i32, i32, i32
  }
  func.func @transform_4(%arg0: i32, %arg1: i32) -> (i32, i32) {
    %c0_i32 = arith.constant 0 : i32
    %c0_i32_0 = arith.constant 0 : i32
    %c0_i32_1 = arith.constant 0 : i32
    return %c0_i32, %c0_i32_0 : i32, i32
  }
  func.func @transform_5(%arg0: i32, %arg1: i32) -> (i32, i32) {
    %c0_i32 = arith.constant 0 : i32
    %c0_i32_0 = arith.constant 0 : i32
    %c0_i32_1 = arith.constant 0 : i32
    return %c0_i32, %c0_i32_0 : i32, i32
  }
}

</mosaic_0001>

<bundles_post_ra>
// kernel: tpu_custom_call.1
= control target key start
LH: loop header
LB: loop body
LE: loop exit
PB: predicated region body
PF: predicated region fallthrough
CT: control target
= control target key end

     0   :  { %11 = vsyncpa [#allocation3], 0  ;;  %s5791_s0 = inlined_call_operand.vmem [shape: f32[4,2], index: 0, kind: input, shape index: {}]   ;;  %s5792_s1 = inlined_call_operand.vmem [shape: f32[4,1], index: 1, kind: input, shape index: {}]   ;;  %s5793_s2 = inlined_call_operand.hbm [shape: f32[1,2,16384], index: 2, kind: input, shape index: {}]   ;;  %s5794_s3 = inlined_call_operand.hbm [shape: f32[1,4,16384], index: 3, kind: output, shape index: {0}]   ;;  %s5795_s4 = inlined_call_operand.vmem [shape: f32[4,1], index: 4, kind: output, shape index: {1}]   ;;  %s5796_s5 = inlined_call_operand.vmem [shape: f32[4,1], index: 5, kind: output, shape index: {2}]  }
   0x1   :  { %13 = vsyncpa [#allocation3 + $0x1], 0 }
   0x2   :  { %14 = vsyncpa [#allocation4], 0 }
   0x3   :  { %16 = vsyncpa [#allocation4 + $0x1], 0  ;;  %s2561_s18 = smov 0   ;;  %s2563_s19 = smov 0  }
   0x4   :  { %s2565_s20 = smov 0   ;;  %s2567_s21 = smov 0  }
   0x5   :  { %s2569_s22 = smov 0   ;;  %s2571_s23 = smov 0  }
   0x6 LB: > { %s2324_s24 = sadd.s32 4294967295, %s2524_s23   ;;  %s2325_s25 = sadd.s32 4294967294, %s2524_s23   ;;  %s2524_s23 = sphi %s2571_s23, %s22_s23   ;;  %s2520_s22 = sphi %s2569_s22, %s6447_s22   ;;  %s2516_s21 = sphi %s2567_s21, %s6446_s21   ;;  %s2512_s20 = sphi %s2565_s20, %s6445_s20   ;;  %s2508_s19 = sphi %s2563_s19, %s6444_s19   ;;  %s2504_s18 = sphi %s2561_s18, %s6443_s18  }
   0x7   : > { %s31_s26 = sadd.s32 1, %s2520_s22  ;;  %s85_s27 = sadd.s32 1, %s2512_s20 }
   0x8   : > { %p32_p0 = scmp.ge.s32.totalorder %s31_s26, 2  ;;  %p92_p1 = scmp.ne.s32.totalorder %s2512_s20, %s2508_s19 }
   0x9   : > { %p93_p2 = scmp.eq.s32.totalorder %s2524_s23, 0  ;;  %p98_p3 = scmp.ne.s32.totalorder %s2508_s19, %s2504_s18 }
   0xa   : > { %s6449_s26 = smov (%p32_p0, %s31_s26), 0  ;;  %p99_p5 = scmp.eq.s32.totalorder %s2324_s24, 0 }
   0xb   : > { %p2602_p4 = por %p93_p2, %p92_p1  ;;  %s81_s29 = ssub.s32 %s2520_s22, %s6449_s26 }
   0xc   : > { %p124_p6 = scmp.eq.s32.totalorder %s2324_s24, 1  ;;  %p83_p7 = scmp.eq.s32.totalorder %s81_s29, 0 }
   0xd   : > { %p2608_p8 = por %p99_p5, %p98_p3  ;;  %p130_p10 = scmp.eq.s32.totalorder %s2325_s25, 1 }
   0xe   : > { %p2612_p9 = por %p124_p6, %p92_p1  ;;  %p2355_p13 = scmp.lt.s32.totalorder %s2524_s23, 2 }
   0xf   : > { %s2617_s7 = scalar_select %p83_p7, %s2512_s20, %s85_s27  }
  0x10   : > { %s5841_s6 = scalar_select %p2612_p9, 1, 0 }
  0x11   : > { %p2619_p11 = por %p130_p10, %p98_p3  ;;  %s198_s9 = sand.u32 1, %s2512_s20  }
  0x12   : > { %s2328_s10 = sshll.u32 %s198_s9, 7  ;;  %s2340_s11 = sshll.u32 %s2520_s22, 11 }
  0x13   : > { %s5842_s8 = scalar_select %p2619_p11, 1, 0 }
  0x14   : > { %s2630_s14 = scalar_lea.hbm %s5793_s2, %s2340_s11  ;;  %s202_s15 = scalar_lea.vmem [#allocation2], %s2328_s10 }
  0x15   : > { %s212_s16 = sshll.u32 %s202_s15, 4  ;;  %p2636_p0 = pnand %p2355_p13, %p2602_p4  ;;  %s2632_s16 = int_to_ptr.vmem [resolvable:$true] %s212_s16 }
  0x16   : > { %s199_s24 = scalar_lea.sflag [#allocation3], %s198_s9  ;;  %s2412_s25 = scalar_lea.hbm %s2630_s14, 2048 }
  0x17   : > { %p2413_p3 = scmp.ne.s32.totalorder %s2630_s14, %s2412_s25  ;;  %p2414_p5 = pneg %p2636_p0 }
  0x18   : > { %s2417_s28 = scalar_lea.hbm %s5793_s2, 4096  ;;  %p2418_p4 = scmp.lt.u32.totalorder %s2630_s14, %s5793_s2 }
  0x19   : > { %p2415_p6 = pnand %p2414_p5, %p2413_p3  ;;  %p2419_p10 = scmp.lt.u32.totalorder %s2417_s28, %s2412_s25 }
  0x1a   : > { %p2421_p12 = scmp.lt.u32.totalorder %s2412_s25, %s2630_s14 }
  0x1b   : > { %p2416_p7 = pneg %p2415_p6  ;;  %p2420_p13 = por %p2419_p10, %p2418_p4 }
  0x1d   : > { %p2422_p1 = por %p2421_p12, %p2420_p13 }
  0x1f   : > { %p2423_p2 = pnand %p2422_p1, %p2416_p7 }
  0x21   : > { %2426 = shalt.err (!%p2423_p2)
}
  0x22   : > { %s2427_s9 = scalar_lea.vmem %s2632_s16, 2048  ;;  %s2526_s12 = smov [#allocation2]  }
  0x23   : > { %p2428_p3 = scmp.ne.s32.totalorder %s2632_s16, %s2427_s9  ;;  %s2432_s13 = sshll.u32 %s2526_s12, 4  ;;  %s2433_s13 = int_to_ptr.vmem [resolvable:$false] %s2432_s13 }
  0x24   : > { %s2434_s15 = scalar_lea.vmem %s2433_s13, 4096  ;;  %p2435_p9 = scmp.lt.s32.totalorder %s2632_s16, %s2433_s13 }
  0x25   : > { %p2430_p6 = pnand %p2428_p3, %p2414_p5  ;;  %p2436_p4 = scmp.lt.s32.totalorder %s2434_s15, %s2427_s9 }
  0x27   : > { %p2431_p11 = pneg %p2430_p6  ;;  %p2437_p10 = por %p2436_p4, %p2435_p9 }
  0x29   : > { %p2438_p12 = pnand %p2437_p10, %p2431_p11 }
  0x2b   : > { %2441 = shalt.err (!%p2438_p12)
}
  0x2c   : > { %2350 = dma.hbm_to_vmem [thread:$0]  (!%p2636_p0), %s2630_s14, 2048, %s2632_s16, %s199_s24  }
  0x2d   : > { %p5844_p1 = scmp.lt.s32.totalorder %s2524_s23, 3  ;;  %p5845_p2 = scmp.ge.s32.totalorder %s2524_s23, 1 }
  0x2f   : > { %p218_p5 = pnand %p5845_p2, %p5844_p1 }
  0x31   : > { %221 = sbr.rel (%p218_p5) target bundleno = 622 (0x26e), region = 32 }
  0x38   : > { %s2672_s25 = sand.u32 1, %s2508_s19  }
  0x39   : > { %s2332_s27 = sshll.u32 %s2672_s25, 7  ;;  %s224_s29 = scalar_lea.sflag [#allocation3], %s2672_s25 }
  0x3a   : > { %s2676_s28 = scalar_lea.vmem [#allocation2], %s2332_s27 }
  0x3b   : > { %2495 = dma.done.wait (%p2608_p8), %s224_s29, 2048  }
  0x3c   : > { %2497 = vsyncadd (%p2608_p8), %s224_s29, 4294965248  ;;  %s2333_s14 = sshll.u32 %s2672_s25, 8  ;;  %p257_p9 = scmp.eq.s32.totalorder %s2516_s21, 0 }
  0x3d   : > { %s2684_s16 = scalar_lea.vmem [#allocation5], %s2333_s14  ;;  %vm262_vm0 = vcmask (%p257_p9), 3072   ;;  %v2527_v0 = vmov (%p257_p9), 0.0  }
  0x3e   : > { %261 = sbr.rel (!%p257_p9) target bundleno = 69 (0x45), region = 40  ;;  %263 = vst.msk [vmem:[%s5795_s4] sm:$0xf] (%p257_p9), %vm262_vm0, %v2527_v0  ;;  %264 = vst.msk [vmem:[%s5796_s5] sm:$0xf] (%p257_p9), %vm262_vm0, %v2527_v0 }
  0x45 PF: > { %v281_v1 = vld [vmem:[%s5791_s0] sm:$0xf]  ;;  %v2528_v3 = vmov 0   ;;  %v2529_v4 = vmov 1   ;;  %v304_v5 = vlaneseq  ;;  %v2713_v11 = vld [vmem:[%s2676_s28 + $0x8] sm:$0xff]  ;;  %v2719_v13 = vld [vmem:[%s2676_s28 + $0x10] sm:$0xff] }
  0x46   : > { %v282_v2 = vld [vmem:[%s5792_s1] sm:$0xf]  ;;  %2408 = vset.pattern.permute.xlu0 %v2528_v3  ;;  %2410 = vset.pattern.permute.xlu1 %v2528_v3  ;;  %v2722_v14 = vld [vmem:[%s2676_s28 + $0x18] sm:$0xff]  ;;  %v2744_v24 = vld [vmem:[%s2676_s28 + $0x28] sm:$0xff]  ;;  %vm1882_vm1 = vcmask 1043456   ;;  %s2342_s15 = sshll.u32 %s2516_s21, 12 }
  0x47   : > { %285 = vperm.xlu0 %2408, %v281_v1   ;;  %1654 = vperm.xlu1 %2410, %v282_v2   ;;  %v2698_v6 = vshrl.u32 %v304_v5, 7  ;;  %v2710_v10 = vld [vmem:[%s2676_s28] sm:$0xff]  ;;  %v2755_v29 = vld [vmem:[%s2676_s28 + $0x30] sm:$0xff]  ;;  %v2766_v34 = vld [vmem:[%s2676_s28 + $0x38] sm:$0xff]  ;;  %s2228_s14 = sshll.u32 %s2684_s16, 4  ;;  %s2212_s17 = scalar_lea.sflag [#allocation4], %s2672_s25  ;;  %s2229_s14 = int_to_ptr.vmem [resolvable:$true] %s2228_s14 }
  0x48   : > { %v2733_v19 = vld [vmem:[%s2676_s28 + $0x20] sm:$0xff]  ;;  %v2788_v44 = vld [vmem:[%s2676_s28 + $0x48] sm:$0xff]  ;;  %v2799_v49 = vld [vmem:[%s2676_s28 + $0x50] sm:$0xff]  ;;  %s2442_s24 = scalar_lea.vmem %s2229_s14, 4096  ;;  %p6440_p11 = scmp.ne.s32.totalorder %s5841_s6, 0 }
  0x49   : > { %v2701_v7 = vsub.s32 0, %v2698_v6  ;;  %v2704_v8 = vsub.s32 2, %v2698_v6  ;;  %v2707_v9 = vsub.s32 4, %v2698_v6  ;;  %v2716_v12 = vsub.s32 6, %v2698_v6  ;;  %v2777_v39 = vld [vmem:[%s2676_s28 + $0x40] sm:$0xff]  ;;  %v2810_v54 = vld [vmem:[%s2676_s28 + $0x58] sm:$0xff]  ;;  %p2443_p8 = scmp.ne.s32.totalorder %s2229_s14, %s2442_s24 }
  0x4a   : > { %v2821_v59 = vld [vmem:[%s2676_s28 + $0x60] sm:$0xff]  ;;  %v2832_v0 = vld [vmem:[%s2676_s28 + $0x68] sm:$0xff]  ;;  %v2843_v5 = vld [vmem:[%s2676_s28 + $0x70] sm:$0xff]  ;;  %s2530_s10 = smov [#allocation5]  }
  0x4b   : > { %2409 = vset.pattern.permute.xlu0 %v2529_v4  ;;  %v307_v15 = vrot.slane %v2710_v10, %v2701_v7  ;;  %v311_v16 = vrot.slane %v2710_v10, %v2704_v8  ;;  %v315_v17 = vrot.slane %v2710_v10, %v2707_v9  ;;  %v323_v18 = vrot.slane %v2713_v11, %v2701_v7  ;;  %v2854_v61 = vld [vmem:[%s2676_s28 + $0x78] sm:$0xff]  ;;  %s5735_s28 = scalar_lea.hbm %s5794_s3, %s2342_s15  ;;  %p2444_p0 = pnand %p2443_p8, %p6440_p11 }
  0x4c   : > { %945 = vperm.xlu0 %2409, %v281_v1   ;;  %v319_v20 = vrot.slane %v2710_v10, %v2716_v12  ;;  %v327_v21 = vrot.slane %v2713_v11, %v2704_v8  ;;  %v331_v22 = vrot.slane %v2713_v11, %v2707_v9  ;;  %v335_v23 = vrot.slane %v2713_v11, %v2716_v12  ;;  %s2446_s11 = sshll.u32 %s2530_s10, 4  ;;  %s2447_s11 = int_to_ptr.vmem [resolvable:$false] %s2446_s11 }
  0x4d   : > { %v339_v25 = vrot.slane %v2719_v13, %v2701_v7  ;;  %v343_v26 = vrot.slane %v2719_v13, %v2704_v8  ;;  %v347_v27 = vrot.slane %v2719_v13, %v2707_v9  ;;  %v351_v28 = vrot.slane %v2719_v13, %v2716_v12  ;;  %p2445_p7 = pneg %p2444_p0  ;;  %s2448_s30 = scalar_lea.vmem %s2447_s11, 8192 }
  0x4e   : > { %v355_v30 = vrot.slane %v2722_v14, %v2701_v7  ;;  %v359_v31 = vrot.slane %v2722_v14, %v2704_v8  ;;  %v363_v32 = vrot.slane %v2722_v14, %v2707_v9  ;;  %v367_v33 = vrot.slane %v2722_v14, %v2716_v12  ;;  %p2449_p13 = scmp.lt.s32.totalorder %s2229_s14, %s2447_s11  ;;  %p2450_p3 = scmp.lt.s32.totalorder %s2448_s30, %s2442_s24 }
  0x4f   : > { %v371_v35 = vrot.slane %v2733_v19, %v2701_v7  ;;  %v375_v36 = vrot.slane %v2733_v19, %v2704_v8  ;;  %v379_v37 = vrot.slane %v2733_v19, %v2707_v9  ;;  %v383_v38 = vrot.slane %v2733_v19, %v2716_v12 }
  0x50   : > { %2411 = vset.pattern.permute.xlu0 %v2528_v3  ;;  %v387_v40 = vrot.slane %v2744_v24, %v2701_v7  ;;  %v391_v41 = vrot.slane %v2744_v24, %v2704_v8  ;;  %v395_v42 = vrot.slane %v2744_v24, %v2707_v9  ;;  %v399_v43 = vrot.slane %v2744_v24, %v2716_v12  ;;  %p2451_p6 = por %p2450_p3, %p2449_p13 }
  0x51   : > { %v403_v45 = vrot.slane %v2755_v29, %v2701_v7  ;;  %v407_v46 = vrot.slane %v2755_v29, %v2704_v8  ;;  %v411_v47 = vrot.slane %v2755_v29, %v2707_v9  ;;  %v415_v48 = vrot.slane %v2755_v29, %v2716_v12 }
  0x52   : > { %v419_v50 = vrot.slane %v2766_v34, %v2701_v7  ;;  %v423_v51 = vrot.slane %v2766_v34, %v2704_v8  ;;  %v427_v52 = vrot.slane %v2766_v34, %v2707_v9  ;;  %v431_v53 = vrot.slane %v2766_v34, %v2716_v12  ;;  %p2452_p4 = pnand %p2451_p6, %p2445_p7 }
  0x53   : > { %v435_v55 = vrot.slane %v2777_v39, %v2701_v7  ;;  %v439_v56 = vrot.slane %v2777_v39, %v2704_v8  ;;  %v443_v57 = vrot.slane %v2777_v39, %v2707_v9  ;;  %v447_v58 = vrot.slane %v2777_v39, %v2716_v12 }
  0x54   : > { %v2892_v63 = vrot.slane %v307_v15, %v2701_v7  ;;  %v2898_v2 = vrot.slane %v311_v16, %v2701_v7  ;;  %v2904_v3 = vrot.slane %v315_v17, %v2701_v7  ;;  %v2910_v4 = vrot.slane %v319_v20, %v2701_v7 }
  0x55   : > { %v2916_v15 = vrot.slane %v323_v18, %v2701_v7  ;;  %v2922_v16 = vrot.slane %v327_v21, %v2701_v7  ;;  %v2928_v17 = vrot.slane %v331_v22, %v2701_v7  ;;  %v2934_v20 = vrot.slane %v335_v23, %v2701_v7 }
  0x56   : > { %v2940_v18 = vrot.slane %v339_v25, %v2701_v7  ;;  %v2946_v21 = vrot.slane %v343_v26, %v2701_v7  ;;  %v2952_v22 = vrot.slane %v347_v27, %v2701_v7  ;;  %v2958_v23 = vrot.slane %v351_v28, %v2701_v7 }
  0x57   : > { %v2964_v25 = vrot.slane %v355_v30, %v2701_v7  ;;  %v2970_v26 = vrot.slane %v359_v31, %v2701_v7  ;;  %v2976_v27 = vrot.slane %v363_v32, %v2701_v7  ;;  %v2982_v28 = vrot.slane %v367_v33, %v2701_v7 }
  0x58   : > { %v2988_v30 = vrot.slane %v371_v35, %v2701_v7  ;;  %v2994_v31 = vrot.slane %v375_v36, %v2701_v7  ;;  %v3000_v32 = vrot.slane %v379_v37, %v2701_v7  ;;  %v3006_v33 = vrot.slane %v383_v38, %v2701_v7 }
  0x59   : > { %v3012_v35 = vrot.slane %v387_v40, %v2701_v7  ;;  %v3018_v36 = vrot.slane %v391_v41, %v2701_v7  ;;  %v3024_v37 = vrot.slane %v395_v42, %v2701_v7  ;;  %v3030_v38 = vrot.slane %v399_v43, %v2701_v7 }
  0x5a   : > { %v3036_v40 = vrot.slane %v403_v45, %v2701_v7  ;;  %v3042_v41 = vrot.slane %v407_v46, %v2701_v7  ;;  %v3048_v42 = vrot.slane %v411_v47, %v2701_v7  ;;  %v3054_v43 = vrot.slane %v415_v48, %v2701_v7 }
  0x5b   : > { %v3060_v45 = vrot.slane %v419_v50, %v2701_v7  ;;  %v3066_v46 = vrot.slane %v423_v51, %v2701_v7  ;;  %v3072_v47 = vrot.slane %v427_v52, %v2701_v7  ;;  %v3078_v48 = vrot.slane %v431_v53, %v2701_v7 }
  0x5c   : > { %v3084_v50 = vrot.slane %v435_v55, %v2701_v7  ;;  %v3090_v51 = vrot.slane %v439_v56, %v2701_v7  ;;  %v3096_v52 = vrot.slane %v443_v57, %v2701_v7  ;;  %v3102_v53 = vrot.slane %v447_v58, %v2701_v7 }
  0x5d   : > { %v5850_v55 = vrot.slane %v2788_v44, %v2701_v7  ;;  %v5852_v56 = vrot.slane %v2788_v44, %v2704_v8  ;;  %v5854_v57 = vrot.slane %v2788_v44, %v2707_v9  ;;  %v5856_v58 = vrot.slane %v2788_v44, %v2716_v12 }
  0x5e   : > { %5846 = vst [vmem:[#allocation8_spill] sm:$0xff] %v3084_v50  ;;  %5847 = vst [vmem:[#allocation9_spill] sm:$0xff] %v3090_v51 }
  0x5f   : > { %5848 = vst [vmem:[#allocation10_spill] sm:$0xff] %v3096_v52  ;;  %5849 = vst [vmem:[#allocation11_spill] sm:$0xff] %v3102_v53  ;;  %v3108_v60 = vrot.slane %v5850_v55, %v2701_v7  ;;  %v3114_v1 = vrot.slane %v5852_v56, %v2701_v7  ;;  %v3120_v62 = vrot.slane %v5854_v57, %v2701_v7 }
  0x60   : > { %v3126_v53 = vrot.slane %v5856_v58, %v2701_v7  ;;  %v5858_v55 = vrot.slane %v2799_v49, %v2701_v7  ;;  %v5860_v56 = vrot.slane %v2799_v49, %v2704_v8  ;;  %v5862_v57 = vrot.slane %v2799_v49, %v2707_v9 }
  0x61   : > { %5851 = vst [vmem:[#allocation12_spill] sm:$0xff] %v3108_v60  ;;  %5853 = vst [vmem:[#allocation13_spill] sm:$0xff] %v3114_v1  ;;  %v5864_v58 = vrot.slane %v2799_v49, %v2716_v12  ;;  %v5886_v52 = vrot.slane %v2832_v0, %v2707_v9 }
  0x62   : > { %5855 = vst [vmem:[#allocation14_spill] sm:$0xff] %v3120_v62  ;;  %5857 = vst [vmem:[#allocation15_spill] sm:$0xff] %v3126_v53  ;;  %v3132_v60 = vrot.slane %v5858_v55, %v2701_v7  ;;  %v3138_v1 = vrot.slane %v5860_v56, %v2701_v7  ;;  %v3144_v62 = vrot.slane %v5862_v57, %v2701_v7 }
  0x63   : > { %v3150_v53 = vrot.slane %v5864_v58, %v2701_v7  ;;  %v5866_v55 = vrot.slane %v2810_v54, %v2701_v7  ;;  %v5868_v56 = vrot.slane %v2810_v54, %v2704_v8  ;;  %v5870_v57 = vrot.slane %v2810_v54, %v2707_v9 }
  0x64   : > { %5859 = vst [vmem:[#allocation16_spill] sm:$0xff] %v3132_v60  ;;  %5861 = vst [vmem:[#allocation17_spill] sm:$0xff] %v3138_v1  ;;  %v5872_v58 = vrot.slane %v2810_v54, %v2716_v12  ;;  %v3228_v51 = vrot.slane %v5886_v52, %v2701_v7  ;;  %v5894_v52 = vrot.slane %v2843_v5, %v2707_v9 }
  0x65   : > { %5863 = vst [vmem:[#allocation18_spill] sm:$0xff] %v3144_v62  ;;  %5865 = vst [vmem:[#allocation19_spill] sm:$0xff] %v3150_v53  ;;  %v3156_v60 = vrot.slane %v5866_v55, %v2701_v7  ;;  %v3162_v1 = vrot.slane %v5868_v56, %v2701_v7  ;;  %v3168_v62 = vrot.slane %v5870_v57, %v2701_v7 }
  0x66   : > { %v3174_v53 = vrot.slane %v5872_v58, %v2701_v7  ;;  %v5874_v55 = vrot.slane %v2821_v59, %v2701_v7  ;;  %v5876_v56 = vrot.slane %v2821_v59, %v2704_v8  ;;  %v5878_v57 = vrot.slane %v2821_v59, %v2707_v9  ;;  %5887 = vst [vmem:[#allocation30_spill] sm:$0xff] %v3228_v51 }
  0x67   : > { %5867 = vst [vmem:[#allocation20_spill] sm:$0xff] %v3156_v60  ;;  %5869 = vst [vmem:[#allocation21_spill] sm:$0xff] %v3162_v1  ;;  %v5880_v58 = vrot.slane %v2821_v59, %v2716_v12  ;;  %v3252_v51 = vrot.slane %v5894_v52, %v2701_v7  ;;  %v5900_v52 = vrot.slane %v2854_v61, %v2707_v9 }
  0x68   : > { %5871 = vst [vmem:[#allocation22_spill] sm:$0xff] %v3168_v62  ;;  %5873 = vst [vmem:[#allocation23_spill] sm:$0xff] %v3174_v53  ;;  %v3180_v60 = vrot.slane %v5874_v55, %v2701_v7  ;;  %v3186_v1 = vrot.slane %v5876_v56, %v2701_v7  ;;  %v3192_v62 = vrot.slane %v5878_v57, %v2701_v7  ;;  %v3201_v55 = vsub.s32 1, %v2698_v6 }
  0x69   : > { %v3198_v53 = vrot.slane %v5880_v58, %v2701_v7  ;;  %v3207_v56 = vsub.s32 5, %v2698_v6  ;;  %v5882_v57 = vrot.slane %v2832_v0, %v2701_v7  ;;  %v5884_v58 = vrot.slane %v2832_v0, %v2704_v8  ;;  %5895 = vst [vmem:[#allocation34_spill] sm:$0xff] %v3252_v51 }
  0x6a   : > { %5875 = vst [vmem:[#allocation24_spill] sm:$0xff] %v3180_v60  ;;  %5877 = vst [vmem:[#allocation25_spill] sm:$0xff] %v3186_v1  ;;  %v3204_v60 = vsub.s32 3, %v2698_v6  ;;  %v3210_v1 = vsub.s32 7, %v2698_v6  ;;  %v5888_v6 = vrot.slane %v2832_v0, %v2716_v12  ;;  %v3276_v51 = vrot.slane %v5900_v52, %v2701_v7 }
  0x6b   : > { %5879 = vst [vmem:[#allocation26_spill] sm:$0xff] %v3192_v62  ;;  %5881 = vst [vmem:[#allocation27_spill] sm:$0xff] %v3198_v53  ;;  %v3216_v62 = vrot.slane %v5882_v57, %v2701_v7  ;;  %v3222_v53 = vrot.slane %v5884_v58, %v2701_v7  ;;  %v5890_v57 = vrot.slane %v2843_v5, %v2701_v7 }
  0x6c   : > { %v3234_v50 = vrot.slane %v5888_v6, %v2701_v7  ;;  %v5892_v58 = vrot.slane %v2843_v5, %v2704_v8  ;;  %v5896_v6 = vrot.slane %v2843_v5, %v2716_v12  ;;  %v5903_v9 = vrot.slane %v2710_v10, %v3204_v60 }
  0x6d   : > { %5883 = vst [vmem:[#allocation28_spill] sm:$0xff] %v3216_v62  ;;  %5885 = vst [vmem:[#allocation29_spill] sm:$0xff] %v3222_v53  ;;  %v3240_v62 = vrot.slane %v5890_v57, %v2701_v7  ;;  %v5898_v57 = vrot.slane %v2854_v61, %v2701_v7 }
  0x6e   : > { %5889 = vst [vmem:[#allocation31_spill] sm:$0xff] %v3234_v50  ;;  %v3246_v53 = vrot.slane %v5892_v58, %v2701_v7  ;;  %v3258_v50 = vrot.slane %v5896_v6, %v2701_v7  ;;  %v5899_v58 = vrot.slane %v2854_v61, %v2704_v8  ;;  %v5901_v6 = vrot.slane %v2854_v61, %v2716_v12 }
  0x6f   : > { %5891 = vst [vmem:[#allocation32_spill] sm:$0xff] %v3240_v62  ;;  %v3264_v62 = vrot.slane %v5898_v57, %v2701_v7  ;;  %v951_v57 = vrot.slane %v2710_v10, %v3201_v55  ;;  %v3422_v52 = vrot.slane %v5903_v9, %v3201_v55  ;;  %v5905_v12 = vrot.slane %v2710_v10, %v3207_v56 }
  0x70   : > { %5893 = vst [vmem:[#allocation33_spill] sm:$0xff] %v3246_v53  ;;  %5897 = vst [vmem:[#allocation35_spill] sm:$0xff] %v3258_v50  ;;  %v3270_v53 = vrot.slane %v5899_v58, %v2701_v7  ;;  %v3282_v50 = vrot.slane %v5901_v6, %v2701_v7  ;;  %v5907_v6 = vrot.slane %v2710_v10, %v3210_v1 }
  0x71   : > { %v3416_v58 = vrot.slane %v951_v57, %v3201_v55  ;;  %5904 = vst [vmem:[#allocation37_spill] sm:$0xff] %v3422_v52  ;;  %v3428_v7 = vrot.slane %v5905_v12, %v3201_v55  ;;  %v5908_v57 = vrot.slane %v2713_v11, %v3201_v55  ;;  %v5910_v9 = vrot.slane %v2713_v11, %v3204_v60 }
  0x72   : > { %v3434_v8 = vrot.slane %v5907_v6, %v3201_v55  ;;  %v5912_v12 = vrot.slane %v2713_v11, %v3207_v56  ;;  %v5914_v10 = vrot.slane %v2713_v11, %v3210_v1  ;;  %v5921_v11 = vrot.slane %v2719_v13, %v3210_v1 }
  0x73   : > { %5902 = vst [vmem:[#allocation36_spill] sm:$0xff] %v3416_v58  ;;  %5906 = vst [vmem:[#allocation38_spill] sm:$0xff] %v3428_v7  ;;  %v3440_v58 = vrot.slane %v5908_v57, %v3201_v55  ;;  %v3446_v52 = vrot.slane %v5910_v9, %v3201_v55  ;;  %v5915_v57 = vrot.slane %v2719_v13, %v3201_v55 }
  0x74   : > { %v3452_v7 = vrot.slane %v5912_v12, %v3201_v55  ;;  %v3458_v6 = vrot.slane %v5914_v10, %v3201_v55  ;;  %v5917_v9 = vrot.slane %v2719_v13, %v3204_v60  ;;  %v5919_v12 = vrot.slane %v2719_v13, %v3207_v56 }
  0x75   : > { %5909 = vst [vmem:[#allocation39_spill] sm:$0xff] %v3440_v58  ;;  %5911 = vst [vmem:[#allocation40_spill] sm:$0xff] %v3446_v52  ;;  %v3464_v58 = vrot.slane %v5915_v57, %v3201_v55  ;;  %v3482_v10 = vrot.slane %v5921_v11, %v3201_v55  ;;  %v5922_v57 = vrot.slane %v2722_v14, %v3201_v55 }
  0x76   : > { %5913 = vst [vmem:[#allocation41_spill] sm:$0xff] %v3452_v7  ;;  %v3470_v52 = vrot.slane %v5917_v9, %v3201_v55  ;;  %v3476_v7 = vrot.slane %v5919_v12, %v3201_v55  ;;  %v5924_v9 = vrot.slane %v2722_v14, %v3204_v60  ;;  %v5926_v12 = vrot.slane %v2722_v14, %v3207_v56 }
  0x77   : > { %5916 = vst [vmem:[#allocation42_spill] sm:$0xff] %v3464_v58  ;;  %v3488_v58 = vrot.slane %v5922_v57, %v3201_v55  ;;  %v5928_v13 = vrot.slane %v2722_v14, %v3210_v1  ;;  %v5929_v57 = vrot.slane %v2733_v19, %v3201_v55  ;;  %v5935_v14 = vrot.slane %v2733_v19, %v3210_v1 }
  0x78   : > { %5918 = vst [vmem:[#allocation43_spill] sm:$0xff] %v3470_v52  ;;  %5920 = vst [vmem:[#allocation44_spill] sm:$0xff] %v3476_v7  ;;  %v3494_v52 = vrot.slane %v5924_v9, %v3201_v55  ;;  %v3500_v7 = vrot.slane %v5926_v12, %v3201_v55  ;;  %v5931_v9 = vrot.slane %v2733_v19, %v3204_v60 }
  0x79   : > { %5923 = vst [vmem:[#allocation45_spill] sm:$0xff] %v3488_v58  ;;  %v3506_v11 = vrot.slane %v5928_v13, %v3201_v55  ;;  %v3512_v58 = vrot.slane %v5929_v57, %v3201_v55  ;;  %v5933_v12 = vrot.slane %v2733_v19, %v3207_v56  ;;  %v3530_v13 = vrot.slane %v5935_v14, %v3201_v55 }
  0x7a   : > { %5925 = vst [vmem:[#allocation46_spill] sm:$0xff] %v3494_v52  ;;  %5927 = vst [vmem:[#allocation47_spill] sm:$0xff] %v3500_v7  ;;  %v3518_v52 = vrot.slane %v5931_v9, %v3201_v55  ;;  %v5936_v57 = vrot.slane %v2744_v24, %v3201_v55  ;;  %v5938_v9 = vrot.slane %v2744_v24, %v3204_v60 }
  0x7b   : > { %5930 = vst [vmem:[#allocation48_spill] sm:$0xff] %v3512_v58  ;;  %v3524_v7 = vrot.slane %v5933_v12, %v3201_v55  ;;  %v5940_v12 = vrot.slane %v2744_v24, %v3207_v56  ;;  %v5942_v19 = vrot.slane %v2744_v24, %v3210_v1  ;;  %v5949_v24 = vrot.slane %v2755_v29, %v3210_v1 }
  0x7c   : > { %5932 = vst [vmem:[#allocation49_spill] sm:$0xff] %v3518_v52  ;;  %v3536_v58 = vrot.slane %v5936_v57, %v3201_v55  ;;  %v3542_v52 = vrot.slane %v5938_v9, %v3201_v55  ;;  %v5943_v57 = vrot.slane %v2755_v29, %v3201_v55  ;;  %v5945_v9 = vrot.slane %v2755_v29, %v3204_v60 }
  0x7d   : > { %5934 = vst [vmem:[#allocation50_spill] sm:$0xff] %v3524_v7  ;;  %v3548_v7 = vrot.slane %v5940_v12, %v3201_v55  ;;  %v3554_v14 = vrot.slane %v5942_v19, %v3201_v55  ;;  %v5947_v12 = vrot.slane %v2755_v29, %v3207_v56  ;;  %v3578_v19 = vrot.slane %v5949_v24, %v3201_v55 }
  0x7e   : > { %5937 = vst [vmem:[#allocation51_spill] sm:$0xff] %v3536_v58  ;;  %5939 = vst [vmem:[#allocation52_spill] sm:$0xff] %v3542_v52  ;;  %v3560_v58 = vrot.slane %v5943_v57, %v3201_v55  ;;  %v3566_v52 = vrot.slane %v5945_v9, %v3201_v55  ;;  %v5950_v57 = vrot.slane %v2766_v34, %v3201_v55 }
  0x7f   : > { %5941 = vst [vmem:[#allocation53_spill] sm:$0xff] %v3548_v7  ;;  %v3572_v7 = vrot.slane %v5947_v12, %v3201_v55  ;;  %v5952_v9 = vrot.slane %v2766_v34, %v3204_v60  ;;  %v5954_v12 = vrot.slane %v2766_v34, %v3207_v56  ;;  %v5956_v29 = vrot.slane %v2766_v34, %v3210_v1 }
  0x80   : > { %5944 = vst [vmem:[#allocation54_spill] sm:$0xff] %v3560_v58  ;;  %5946 = vst [vmem:[#allocation55_spill] sm:$0xff] %v3566_v52  ;;  %v3584_v58 = vrot.slane %v5950_v57, %v3201_v55  ;;  %v5957_v57 = vrot.slane %v2777_v39, %v3201_v55  ;;  %v5963_v34 = vrot.slane %v2777_v39, %v3210_v1 }
  0x81   : > { %5948 = vst [vmem:[#allocation56_spill] sm:$0xff] %v3572_v7  ;;  %v3590_v52 = vrot.slane %v5952_v9, %v3201_v55  ;;  %v3596_v7 = vrot.slane %v5954_v12, %v3201_v55  ;;  %v3602_v24 = vrot.slane %v5956_v29, %v3201_v55  ;;  %v5959_v9 = vrot.slane %v2777_v39, %v3204_v60 }
  0x82   : > { %5951 = vst [vmem:[#allocation57_spill] sm:$0xff] %v3584_v58  ;;  %v3608_v58 = vrot.slane %v5957_v57, %v3201_v55  ;;  %v5961_v12 = vrot.slane %v2777_v39, %v3207_v56  ;;  %v3626_v29 = vrot.slane %v5963_v34, %v3201_v55  ;;  %v5964_v57 = vrot.slane %v2788_v44, %v3201_v55 }
  0x83   : > { %5953 = vst [vmem:[#allocation58_spill] sm:$0xff] %v3590_v52  ;;  %5955 = vst [vmem:[#allocation59_spill] sm:$0xff] %v3596_v7  ;;  %v3614_v52 = vrot.slane %v5959_v9, %v3201_v55  ;;  %v5966_v9 = vrot.slane %v2788_v44, %v3204_v60  ;;  %v5970_v39 = vrot.slane %v2788_v44, %v3210_v1 }
  0x84   : > { %5958 = vst [vmem:[#allocation60_spill] sm:$0xff] %v3608_v58  ;;  %v3620_v7 = vrot.slane %v5961_v12, %v3201_v55  ;;  %v3632_v58 = vrot.slane %v5964_v57, %v3201_v55  ;;  %v5968_v12 = vrot.slane %v2788_v44, %v3207_v56  ;;  %v5971_v57 = vrot.slane %v2799_v49, %v3201_v55 }
  0x85   : > { %5960 = vst [vmem:[#allocation61_spill] sm:$0xff] %v3614_v52  ;;  %v3638_v52 = vrot.slane %v5966_v9, %v3201_v55  ;;  %v3650_v34 = vrot.slane %v5970_v39, %v3201_v55  ;;  %v5973_v9 = vrot.slane %v2799_v49, %v3204_v60  ;;  %v5977_v44 = vrot.slane %v2799_v49, %v3210_v1 }
  0x86   : > { %5962 = vst [vmem:[#allocation62_spill] sm:$0xff] %v3620_v7  ;;  %5965 = vst [vmem:[#allocation63_spill] sm:$0xff] %v3632_v58  ;;  %v3644_v7 = vrot.slane %v5968_v12, %v3201_v55  ;;  %v3656_v58 = vrot.slane %v5971_v57, %v3201_v55  ;;  %v5975_v12 = vrot.slane %v2799_v49, %v3207_v56 }
  0x87   : > { %5967 = vst [vmem:[#allocation64_spill] sm:$0xff] %v3638_v52  ;;  %v3662_v52 = vrot.slane %v5973_v9, %v3201_v55  ;;  %v3674_v39 = vrot.slane %v5977_v44, %v3201_v55  ;;  %v5978_v57 = vrot.slane %v2810_v54, %v3201_v55  ;;  %v5980_v9 = vrot.slane %v2810_v54, %v3204_v60 }
  0x88   : > { %5969 = vst [vmem:[#allocation65_spill] sm:$0xff] %v3644_v7  ;;  %5972 = vst [vmem:[#allocation66_spill] sm:$0xff] %v3656_v58  ;;  %v3668_v7 = vrot.slane %v5975_v12, %v3201_v55  ;;  %v5982_v12 = vrot.slane %v2810_v54, %v3207_v56  ;;  %v5984_v49 = vrot.slane %v2810_v54, %v3210_v1 }
  0x89   : > { %5974 = vst [vmem:[#allocation67_spill] sm:$0xff] %v3662_v52  ;;  %v3680_v58 = vrot.slane %v5978_v57, %v3201_v55  ;;  %v3686_v52 = vrot.slane %v5980_v9, %v3201_v55  ;;  %v5985_v57 = vrot.slane %v2821_v59, %v3201_v55  ;;  %v5987_v9 = vrot.slane %v2821_v59, %v3204_v60 }
  0x8a   : > { %5976 = vst [vmem:[#allocation68_spill] sm:$0xff] %v3668_v7  ;;  %v3692_v7 = vrot.slane %v5982_v12, %v3201_v55  ;;  %v3698_v44 = vrot.slane %v5984_v49, %v3201_v55  ;;  %v5989_v12 = vrot.slane %v2821_v59, %v3207_v56  ;;  %v5991_v54 = vrot.slane %v2821_v59, %v3210_v1 }
  0x8b   : > { %5979 = vst [vmem:[#allocation69_spill] sm:$0xff] %v3680_v58  ;;  %5981 = vst [vmem:[#allocation70_spill] sm:$0xff] %v3686_v52  ;;  %v3704_v58 = vrot.slane %v5985_v57, %v3201_v55  ;;  %v3710_v52 = vrot.slane %v5987_v9, %v3201_v55  ;;  %v5992_v57 = vrot.slane %v2832_v0, %v3201_v55 }
  0x8c   : > { %5983 = vst [vmem:[#allocation71_spill] sm:$0xff] %v3692_v7  ;;  %v3716_v7 = vrot.slane %v5989_v12, %v3201_v55  ;;  %v3722_v49 = vrot.slane %v5991_v54, %v3201_v55  ;;  %v5994_v9 = vrot.slane %v2832_v0, %v3204_v60  ;;  %v5996_v12 = vrot.slane %v2832_v0, %v3207_v56 }
  0x8d   : > { %5986 = vst [vmem:[#allocation72_spill] sm:$0xff] %v3704_v58  ;;  %5988 = vst [vmem:[#allocation73_spill] sm:$0xff] %v3710_v52  ;;  %v3728_v58 = vrot.slane %v5992_v57, %v3201_v55  ;;  %v5998_v59 = vrot.slane %v2832_v0, %v3210_v1  ;;  %v5999_v57 = vrot.slane %v2843_v5, %v3201_v55 }
  0x8e   : > { %5990 = vst [vmem:[#allocation74_spill] sm:$0xff] %v3716_v7  ;;  %v3734_v52 = vrot.slane %v5994_v9, %v3201_v55  ;;  %v3740_v7 = vrot.slane %v5996_v12, %v3201_v55  ;;  %v6001_v9 = vrot.slane %v2843_v5, %v3204_v60  ;;  %v6003_v12 = vrot.slane %v2843_v5, %v3207_v56 }
  0x8f   : > { %5993 = vst [vmem:[#allocation75_spill] sm:$0xff] %v3728_v58  ;;  %v3746_v54 = vrot.slane %v5998_v59, %v3201_v55  ;;  %v3752_v58 = vrot.slane %v5999_v57, %v3201_v55  ;;  %v6005_v0 = vrot.slane %v2843_v5, %v3210_v1  ;;  %v6009_v5 = vrot.slane %v2854_v61, %v3207_v56 }
  0x90   : > { %5995 = vst [vmem:[#allocation76_spill] sm:$0xff] %v3734_v52  ;;  %5997 = vst [vmem:[#allocation77_spill] sm:$0xff] %v3740_v7  ;;  %v3758_v52 = vrot.slane %v6001_v9, %v3201_v55  ;;  %v3764_v7 = vrot.slane %v6003_v12, %v3201_v55 }
  0x91   : > { %6000 = vst [vmem:[#allocation78_spill] sm:$0xff] %v3752_v58  ;;  %v3770_v59 = vrot.slane %v6005_v0, %v3201_v55  ;;  %v6007_v58 = vrot.slane %v2854_v61, %v3201_v55  ;;  %v3790_v0 = vrot.slane %v6009_v5, %v3201_v55  ;;  %v6029_v5 = vld [vmem:[#allocation11_spill] sm:$0xff] }
  0x92   : > { %6002 = vst [vmem:[#allocation79_spill] sm:$0xff] %v3758_v52  ;;  %6004 = vst [vmem:[#allocation80_spill] sm:$0xff] %v3764_v7  ;;  %v6008_v52 = vrot.slane %v2854_v61, %v3204_v60 }
  0x93   : > { %6006 = vst [vmem:[#allocation81_spill] sm:$0xff] %v3770_v59  ;;  %v3778_v9 = vrot.slane %v6007_v58, %v3201_v55  ;;  %v6010_v59 = vrot.slane %v2854_v61, %v3210_v1 }
  0x94   : > { %v3784_v12 = vrot.slane %v6008_v52, %v3201_v55 }
  0x95   : > { %v3796_v7 = vrot.slane %v6010_v59, %v3201_v55  ;;  %v6025_v55 = vld [vmem:[#allocation9_spill] sm:$0xff]  ;;  %v6027_v59 = vld [vmem:[#allocation10_spill] sm:$0xff] }
  0xc6   : > { %v3772_v57 = vpop.permute.xlu0 %285 }
  0xc7   : > { %v3800_v58 = vmul.f32 %v2892_v63, %v3772_v57  ;;  %v3804_v60 = vmul.f32 %v2898_v2, %v3772_v57  ;;  %v3808_v52 = vmul.f32 %v2904_v3, %v3772_v57  ;;  %v3812_v56 = vmul.f32 %v2910_v4, %v3772_v57 }
  0xc8   : > { %v3816_v61 = vmul.f32 %v2916_v15, %v3772_v57  ;;  %v3820_v63 = vmul.f32 %v2922_v16, %v3772_v57  ;;  %v3824_v1 = vmul.f32 %v2928_v17, %v3772_v57  ;;  %v3828_v2 = vmul.f32 %v2934_v20, %v3772_v57 }
  0xc9   : > { %v3832_v3 = vmul.f32 %v2940_v18, %v3772_v57  ;;  %v3836_v4 = vmul.f32 %v2946_v21, %v3772_v57  ;;  %v3840_v15 = vmul.f32 %v2952_v22, %v3772_v57  ;;  %v3844_v16 = vmul.f32 %v2958_v23, %v3772_v57 }
  0xca   : > { %v3848_v17 = vmul.f32 %v2964_v25, %v3772_v57  ;;  %v3852_v20 = vmul.f32 %v2970_v26, %v3772_v57  ;;  %v3856_v18 = vmul.f32 %v2976_v27, %v3772_v57  ;;  %v3860_v21 = vmul.f32 %v2982_v28, %v3772_v57 }
  0xcb   : > { %v3864_v22 = vmul.f32 %v2988_v30, %v3772_v57  ;;  %v3868_v23 = vmul.f32 %v2994_v31, %v3772_v57  ;;  %v3872_v25 = vmul.f32 %v3000_v32, %v3772_v57  ;;  %v3876_v26 = vmul.f32 %v3006_v33, %v3772_v57 }
  0xcc   : > { %v3880_v27 = vmul.f32 %v3012_v35, %v3772_v57  ;;  %v3884_v28 = vmul.f32 %v3018_v36, %v3772_v57  ;;  %v3888_v30 = vmul.f32 %v3024_v37, %v3772_v57  ;;  %v3892_v31 = vmul.f32 %v3030_v38, %v3772_v57 }
  0xcd   : > { %v3896_v32 = vmul.f32 %v3036_v40, %v3772_v57  ;;  %v3900_v33 = vmul.f32 %v3042_v41, %v3772_v57  ;;  %v3904_v35 = vmul.f32 %v3048_v42, %v3772_v57  ;;  %v3908_v36 = vmul.f32 %v3054_v43, %v3772_v57  ;;  %v6023_v42 = vld [vmem:[#allocation8_spill] sm:$0xff] }
  0xce   : > { %6011 = vst [vmem:[#allocation82_spill] sm:$0xff] %v3880_v27  ;;  %6012 = vst [vmem:[#allocation83_spill] sm:$0xff] %v3884_v28  ;;  %v3912_v37 = vmul.f32 %v3060_v45, %v3772_v57  ;;  %v3916_v38 = vmul.f32 %v3066_v46, %v3772_v57  ;;  %v3920_v40 = vmul.f32 %v3072_v47, %v3772_v57  ;;  %v6104_v28 = vld [vmem:[#allocation54_spill] sm:$0xff]  ;;  %v6106_v27 = vld [vmem:[#allocation55_spill] sm:$0xff] }
  0xcf   : > { %6013 = vst [vmem:[#allocation84_spill] sm:$0xff] %v3888_v30  ;;  %6014 = vst [vmem:[#allocation85_spill] sm:$0xff] %v3892_v31  ;;  %v3924_v41 = vmul.f32 %v3078_v48, %v3772_v57  ;;  %v3928_v43 = vmul.f32 %v6023_v42, %v3772_v57  ;;  %v3932_v45 = vmul.f32 %v6025_v55, %v3772_v57  ;;  %v6100_v31 = vld [vmem:[#allocation52_spill] sm:$0xff]  ;;  %v6101_v30 = vld [vmem:[#allocation53_spill] sm:$0xff] }
  0xd0   : > { %6015 = vst [vmem:[#allocation86_spill] sm:$0xff] %v3896_v32  ;;  %6016 = vst [vmem:[#allocation87_spill] sm:$0xff] %v3900_v33  ;;  %v3936_v46 = vmul.f32 %v6027_v59, %v3772_v57  ;;  %v3940_v47 = vmul.f32 %v6029_v5, %v3772_v57  ;;  %v6097_v33 = vld [vmem:[#allocation50_spill] sm:$0xff]  ;;  %v6098_v32 = vld [vmem:[#allocation51_spill] sm:$0xff] }
  0xd1   : > { %6017 = vst [vmem:[#allocation88_spill] sm:$0xff] %v3904_v35  ;;  %6018 = vst [vmem:[#allocation89_spill] sm:$0xff] %v3908_v36  ;;  %v6095_v36 = vld [vmem:[#allocation48_spill] sm:$0xff]  ;;  %v6096_v35 = vld [vmem:[#allocation49_spill] sm:$0xff] }
  0xd2   : > { %6019 = vst [vmem:[#allocation90_spill] sm:$0xff] %v3912_v37  ;;  %6020 = vst [vmem:[#allocation91_spill] sm:$0xff] %v3916_v38  ;;  %v6073_v38 = vld [vmem:[#allocation33_spill] sm:$0xff]  ;;  %v6094_v37 = vld [vmem:[#allocation47_spill] sm:$0xff] }
  0xd3   : > { %6021 = vst [vmem:[#allocation92_spill] sm:$0xff] %v3920_v40  ;;  %6022 = vst [vmem:[#allocation93_spill] sm:$0xff] %v3924_v41  ;;  %v6031_v40 = vld [vmem:[#allocation12_spill] sm:$0xff]  ;;  %v6033_v41 = vld [vmem:[#allocation13_spill] sm:$0xff] }
  0xd4   : > { %6024 = vst [vmem:[#allocation8_spill] sm:$0xff] %v3928_v43  ;;  %6026 = vst [vmem:[#allocation9_spill] sm:$0xff] %v3932_v45  ;;  %v3944_v48 = vmul.f32 %v6031_v40, %v3772_v57  ;;  %v3948_v42 = vmul.f32 %v6033_v41, %v3772_v57  ;;  %v6035_v43 = vld [vmem:[#allocation14_spill] sm:$0xff]  ;;  %v6037_v45 = vld [vmem:[#allocation15_spill] sm:$0xff] }
  0xd5   : > { %6028 = vst [vmem:[#allocation10_spill] sm:$0xff] %v3936_v46  ;;  %6030 = vst [vmem:[#allocation11_spill] sm:$0xff] %v3940_v47  ;;  %v3952_v55 = vmul.f32 %v6035_v43, %v3772_v57  ;;  %v3956_v59 = vmul.f32 %v6037_v45, %v3772_v57  ;;  %v6039_v46 = vld [vmem:[#allocation16_spill] sm:$0xff]  ;;  %v6041_v47 = vld [vmem:[#allocation17_spill] sm:$0xff] }
  0xd6   : > { %6032 = vst [vmem:[#allocation12_spill] sm:$0xff] %v3944_v48  ;;  %6034 = vst [vmem:[#allocation13_spill] sm:$0xff] %v3948_v42  ;;  %v3960_v5 = vmul.f32 %v6039_v46, %v3772_v57  ;;  %v3964_v40 = vmul.f32 %v6041_v47, %v3772_v57  ;;  %v6043_v48 = vld [vmem:[#allocation18_spill] sm:$0xff]  ;;  %v6045_v42 = vld [vmem:[#allocation19_spill] sm:$0xff] }
  0xd7   : > { %6036 = vst [vmem:[#allocation14_spill] sm:$0xff] %v3952_v55  ;;  %6038 = vst [vmem:[#allocation15_spill] sm:$0xff] %v3956_v59  ;;  %v3968_v41 = vmul.f32 %v6043_v48, %v3772_v57  ;;  %v3972_v43 = vmul.f32 %v6045_v42, %v3772_v57  ;;  %v6047_v55 = vld [vmem:[#allocation20_spill] sm:$0xff]  ;;  %v6049_v59 = vld [vmem:[#allocation21_spill] sm:$0xff] }
  0xd8   : > { %6040 = vst [vmem:[#allocation16_spill] sm:$0xff] %v3960_v5  ;;  %6042 = vst [vmem:[#allocation17_spill] sm:$0xff] %v3964_v40  ;;  %v3976_v45 = vmul.f32 %v6047_v55, %v3772_v57  ;;  %v3980_v46 = vmul.f32 %v6049_v59, %v3772_v57  ;;  %v6051_v5 = vld [vmem:[#allocation22_spill] sm:$0xff]  ;;  %v6053_v40 = vld [vmem:[#allocation23_spill] sm:$0xff] }
  0xd9   : > { %6044 = vst [vmem:[#allocation18_spill] sm:$0xff] %v3968_v41  ;;  %6046 = vst [vmem:[#allocation19_spill] sm:$0xff] %v3972_v43  ;;  %v3984_v47 = vmul.f32 %v6051_v5, %v3772_v57  ;;  %v3988_v48 = vmul.f32 %v6053_v40, %v3772_v57  ;;  %v6055_v41 = vld [vmem:[#allocation24_spill] sm:$0xff]  ;;  %v6057_v43 = vld [vmem:[#allocation25_spill] sm:$0xff] }
  0xda   : > { %6048 = vst [vmem:[#allocation20_spill] sm:$0xff] %v3976_v45  ;;  %6050 = vst [vmem:[#allocation21_spill] sm:$0xff] %v3980_v46  ;;  %v3992_v42 = vmul.f32 %v6055_v41, %v3772_v57  ;;  %v3996_v55 = vmul.f32 %v6057_v43, %v3772_v57  ;;  %v6059_v45 = vld [vmem:[#allocation26_spill] sm:$0xff]  ;;  %v6061_v46 = vld [vmem:[#allocation27_spill] sm:$0xff] }
  0xdb   : > { %6052 = vst [vmem:[#allocation22_spill] sm:$0xff] %v3984_v47  ;;  %6054 = vst [vmem:[#allocation23_spill] sm:$0xff] %v3988_v48  ;;  %v4000_v59 = vmul.f32 %v6059_v45, %v3772_v57  ;;  %v4004_v5 = vmul.f32 %v6061_v46, %v3772_v57  ;;  %v4006_v47 = vpop.permute.xlu0 %945  ;;  %v6063_v40 = vld [vmem:[#allocation28_spill] sm:$0xff]  ;;  %v6065_v41 = vld [vmem:[#allocation29_spill] sm:$0xff] }
  0xdc   : > { %6056 = vst [vmem:[#allocation24_spill] sm:$0xff] %v3992_v42  ;;  %6058 = vst [vmem:[#allocation25_spill] sm:$0xff] %v3996_v55  ;;  %v4010_v48 = vmul.f32 %v6063_v40, %v3772_v57  ;;  %v4014_v42 = vmul.f32 %v6065_v41, %v3772_v57  ;;  %v6067_v43 = vld [vmem:[#allocation30_spill] sm:$0xff]  ;;  %v6069_v45 = vld [vmem:[#allocation31_spill] sm:$0xff]  ;;  %v4030_v40 = vmul.f32 %v6073_v38, %v3772_v57 }
  0xdd   : > { %6060 = vst [vmem:[#allocation26_spill] sm:$0xff] %v4000_v59  ;;  %6062 = vst [vmem:[#allocation27_spill] sm:$0xff] %v4004_v5  ;;  %v4018_v55 = vmul.f32 %v6067_v43, %v3772_v57  ;;  %v4022_v59 = vmul.f32 %v6069_v45, %v3772_v57  ;;  %v6071_v46 = vld [vmem:[#allocation32_spill] sm:$0xff]  ;;  %v4042_v45 = vmul.f32 %v3264_v62, %v3772_v57 }
  0xde   : > { %6064 = vst [vmem:[#allocation28_spill] sm:$0xff] %v4010_v48  ;;  %6066 = vst [vmem:[#allocation29_spill] sm:$0xff] %v4014_v42  ;;  %v4026_v5 = vmul.f32 %v6071_v46, %v3772_v57  ;;  %v6075_v48 = vld [vmem:[#allocation34_spill] sm:$0xff]  ;;  %v6077_v42 = vld [vmem:[#allocation35_spill] sm:$0xff]  ;;  %v4046_v46 = vmul.f32 %v3270_v53, %v3772_v57  ;;  %v4050_v38 = vmul.f32 %v3276_v51, %v3772_v57 }
  0xdf   : > { %6068 = vst [vmem:[#allocation30_spill] sm:$0xff] %v4018_v55  ;;  %6070 = vst [vmem:[#allocation31_spill] sm:$0xff] %v4022_v59  ;;  %v4034_v41 = vmul.f32 %v6075_v48, %v3772_v57  ;;  %v4038_v43 = vmul.f32 %v6077_v42, %v3772_v57  ;;  %v4054_v48 = vmul.f32 %v3282_v50, %v3772_v57  ;;  %v6087_v57 = vld [vmem:[#allocation40_spill] sm:$0xff]  ;;  %v6092_v59 = vld [vmem:[#allocation45_spill] sm:$0xff] }
  0xe0   : > { %6072 = vst [vmem:[#allocation32_spill] sm:$0xff] %v4026_v5  ;;  %6074 = vst [vmem:[#allocation33_spill] sm:$0xff] %v4030_v40  ;;  %v4070_v51 = vmul.f32 %v3434_v8, %v4006_v47  ;;  %v6090_v40 = vld [vmem:[#allocation43_spill] sm:$0xff]  ;;  %v6091_v5 = vld [vmem:[#allocation44_spill] sm:$0xff] }
  0xe1   : > { %6076 = vst [vmem:[#allocation34_spill] sm:$0xff] %v4034_v41  ;;  %6078 = vst [vmem:[#allocation35_spill] sm:$0xff] %v4038_v43  ;;  %v6083_v41 = vld [vmem:[#allocation36_spill] sm:$0xff]  ;;  %v6084_v43 = vld [vmem:[#allocation37_spill] sm:$0xff] }
  0xe2   : > { %6079 = vst [vmem:[#allocation94_spill] sm:$0xff] %v4042_v45  ;;  %6080 = vst [vmem:[#allocation95_spill] sm:$0xff] %v4046_v46  ;;  %v4058_v42 = vmul.f32 %v6083_v41, %v4006_v47  ;;  %v4062_v62 = vmul.f32 %v6084_v43, %v4006_v47  ;;  %v6085_v45 = vld [vmem:[#allocation38_spill] sm:$0xff]  ;;  %v4078_v41 = vmul.f32 %v6087_v57, %v4006_v47 }
  0xe3   : > { %6081 = vst [vmem:[#allocation96_spill] sm:$0xff] %v4050_v38  ;;  %6082 = vst [vmem:[#allocation97_spill] sm:$0xff] %v4054_v48  ;;  %v4066_v53 = vmul.f32 %v6085_v45, %v4006_v47  ;;  %v6086_v38 = vld [vmem:[#allocation39_spill] sm:$0xff]  ;;  %v6088_v48 = vld [vmem:[#allocation41_spill] sm:$0xff]  ;;  %v4086_v45 = vmul.f32 %v3458_v6, %v4006_v47  ;;  %v4098_v57 = vmul.f32 %v6091_v5, %v4006_v47 }
  0xe4   : > { %v4074_v50 = vmul.f32 %v6086_v38, %v4006_v47  ;;  %v4082_v43 = vmul.f32 %v6088_v48, %v4006_v47  ;;  %v6089_v46 = vld [vmem:[#allocation42_spill] sm:$0xff]  ;;  %v4094_v38 = vmul.f32 %v6090_v40, %v4006_v47  ;;  %v4102_v48 = vmul.f32 %v3482_v10, %v4006_v47 }
  0xe5   : > { %v4090_v8 = vmul.f32 %v6089_v46, %v4006_v47  ;;  %v4106_v6 = vmul.f32 %v6092_v59, %v4006_v47  ;;  %v6093_v55 = vld [vmem:[#allocation46_spill] sm:$0xff]  ;;  %v4114_v40 = vmul.f32 %v6094_v37, %v4006_v47  ;;  %v4118_v5 = vmul.f32 %v3506_v11, %v4006_v47 }
  0xe6   : > { %v4110_v46 = vmul.f32 %v6093_v55, %v4006_v47  ;;  %v4122_v10 = vmul.f32 %v6095_v36, %v4006_v47  ;;  %v4126_v59 = vmul.f32 %v6096_v35, %v4006_v47  ;;  %v4130_v55 = vmul.f32 %v6097_v33, %v4006_v47 }
  0xe7   : > { %v4134_v37 = vmul.f32 %v3530_v13, %v4006_v47  ;;  %v4138_v11 = vmul.f32 %v6098_v32, %v4006_v47  ;;  %v4142_v36 = vmul.f32 %v6100_v31, %v4006_v47  ;;  %v4146_v35 = vmul.f32 %v6101_v30, %v4006_v47 }
  0xe8   : > { %v4150_v33 = vmul.f32 %v3554_v14, %v4006_v47  ;;  %v4154_v13 = vmul.f32 %v6104_v28, %v4006_v47  ;;  %v4158_v32 = vmul.f32 %v6106_v27, %v4006_v47  ;;  %v4166_v30 = vmul.f32 %v3578_v19, %v4006_v47 }
  0xe9   : > { %6099 = vst [vmem:[#allocation36_spill] sm:$0xff] %v4138_v11  ;;  %6102 = vst [vmem:[#allocation37_spill] sm:$0xff] %v4146_v35  ;;  %v6107_v11 = vld [vmem:[#allocation56_spill] sm:$0xff]  ;;  %v6110_v35 = vld [vmem:[#allocation57_spill] sm:$0xff] }
  0xea   : > { %6103 = vst [vmem:[#allocation38_spill] sm:$0xff] %v4150_v33  ;;  %6105 = vst [vmem:[#allocation39_spill] sm:$0xff] %v4154_v13  ;;  %v4162_v31 = vmul.f32 %v6107_v11, %v4006_v47  ;;  %v4170_v14 = vmul.f32 %v6110_v35, %v4006_v47  ;;  %v6112_v33 = vld [vmem:[#allocation58_spill] sm:$0xff]  ;;  %v6113_v13 = vld [vmem:[#allocation59_spill] sm:$0xff]  ;;  %v4182_v11 = vmul.f32 %v3602_v24, %v4006_v47 }
  0xeb   : > { %6109 = vst [vmem:[#allocation41_spill] sm:$0xff] %v4166_v30  ;;  %v4174_v28 = vmul.f32 %v6112_v33, %v4006_v47  ;;  %v4178_v27 = vmul.f32 %v6113_v13, %v4006_v47  ;;  %v6118_v30 = vld [vmem:[#allocation61_spill] sm:$0xff]  ;;  %v4198_v13 = vmul.f32 %v3626_v29, %v4006_v47 }
  0xec   : > { %6108 = vst [vmem:[#allocation40_spill] sm:$0xff] %v4162_v31  ;;  %6111 = vst [vmem:[#allocation42_spill] sm:$0xff] %v4170_v14  ;;  %v6116_v31 = vld [vmem:[#allocation60_spill] sm:$0xff]  ;;  %v4190_v35 = vmul.f32 %v6118_v30, %v4006_v47  ;;  %v6119_v14 = vld [vmem:[#allocation62_spill] sm:$0xff] }
  0xed   : > { %6114 = vst [vmem:[#allocation43_spill] sm:$0xff] %v4178_v27  ;;  %6115 = vst [vmem:[#allocation44_spill] sm:$0xff] %v4182_v11  ;;  %v4186_v19 = vmul.f32 %v6116_v31, %v4006_v47  ;;  %v4194_v33 = vmul.f32 %v6119_v14, %v4006_v47  ;;  %v6122_v27 = vld [vmem:[#allocation63_spill] sm:$0xff]  ;;  %v6124_v11 = vld [vmem:[#allocation64_spill] sm:$0xff]  ;;  %v4214_v14 = vmul.f32 %v3650_v34, %v4006_v47 }
  0xee   : > { %6121 = vst [vmem:[#allocation47_spill] sm:$0xff] %v4198_v13  ;;  %v4202_v24 = vmul.f32 %v6122_v27, %v4006_v47  ;;  %v4206_v31 = vmul.f32 %v6124_v11, %v4006_v47  ;;  %v6130_v13 = vld [vmem:[#allocation67_spill] sm:$0xff] }
  0xef   : > { %6117 = vst [vmem:[#allocation45_spill] sm:$0xff] %v4186_v19  ;;  %6120 = vst [vmem:[#allocation46_spill] sm:$0xff] %v4194_v33  ;;  %v6125_v19 = vld [vmem:[#allocation65_spill] sm:$0xff]  ;;  %v6128_v33 = vld [vmem:[#allocation66_spill] sm:$0xff]  ;;  %v4222_v27 = vmul.f32 %v6130_v13, %v4006_v47 }
  0xf0   : > { %6123 = vst [vmem:[#allocation48_spill] sm:$0xff] %v4202_v24  ;;  %v4210_v30 = vmul.f32 %v6125_v19, %v4006_v47  ;;  %6127 = vst [vmem:[#allocation50_spill] sm:$0xff] %v4214_v14  ;;  %v4218_v29 = vmul.f32 %v6128_v33, %v4006_v47  ;;  %v6131_v24 = vld [vmem:[#allocation68_spill] sm:$0xff]  ;;  %v4230_v19 = vmul.f32 %v3674_v39, %v4006_v47  ;;  %v6136_v14 = vld [vmem:[#allocation70_spill] sm:$0xff] }
  0xf1   : > { %v4226_v11 = vmul.f32 %v6131_v24, %v4006_v47  ;;  %v4238_v33 = vmul.f32 %v6136_v14, %v4006_v47  ;;  %v4246_v24 = vmul.f32 %v3698_v44, %v4006_v47 }
  0xf2   : > { %6126 = vst [vmem:[#allocation49_spill] sm:$0xff] %v4210_v30  ;;  %6129 = vst [vmem:[#allocation51_spill] sm:$0xff] %v4218_v29  ;;  %v6134_v30 = vld [vmem:[#allocation69_spill] sm:$0xff]  ;;  %v6137_v29 = vld [vmem:[#allocation71_spill] sm:$0xff] }
  0xf3   : > { %6132 = vst [vmem:[#allocation52_spill] sm:$0xff] %v4226_v11  ;;  %6133 = vst [vmem:[#allocation53_spill] sm:$0xff] %v4230_v19  ;;  %v4234_v34 = vmul.f32 %v6134_v30, %v4006_v47  ;;  %v4242_v13 = vmul.f32 %v6137_v29, %v4006_v47  ;;  %v6140_v11 = vld [vmem:[#allocation72_spill] sm:$0xff]  ;;  %v6142_v19 = vld [vmem:[#allocation73_spill] sm:$0xff]  ;;  %v4262_v29 = vmul.f32 %v3722_v49, %v4006_v47 }
  0xf4   : > { %6139 = vst [vmem:[#allocation56_spill] sm:$0xff] %v4246_v24  ;;  %v4250_v39 = vmul.f32 %v6140_v11, %v4006_v47  ;;  %v4254_v30 = vmul.f32 %v6142_v19, %v4006_v47  ;;  %v6148_v24 = vld [vmem:[#allocation76_spill] sm:$0xff] }
  0xf5   : > { %6135 = vst [vmem:[#allocation54_spill] sm:$0xff] %v4234_v34  ;;  %6138 = vst [vmem:[#allocation55_spill] sm:$0xff] %v4242_v13  ;;  %v6143_v34 = vld [vmem:[#allocation74_spill] sm:$0xff]  ;;  %v6146_v13 = vld [vmem:[#allocation75_spill] sm:$0xff]  ;;  %v4270_v11 = vmul.f32 %v6148_v24, %v4006_v47 }
  0xf6   : > { %6141 = vst [vmem:[#allocation57_spill] sm:$0xff] %v4250_v39  ;;  %v4258_v14 = vmul.f32 %v6143_v34, %v4006_v47  ;;  %6145 = vst [vmem:[#allocation59_spill] sm:$0xff] %v4262_v29  ;;  %v4266_v44 = vmul.f32 %v6146_v13, %v4006_v47  ;;  %v6150_v39 = vld [vmem:[#allocation77_spill] sm:$0xff]  ;;  %v4278_v34 = vmul.f32 %v3746_v54, %v4006_v47  ;;  %v6152_v29 = vld [vmem:[#allocation79_spill] sm:$0xff] }
  0xf7   : > { %6149 = vst [vmem:[#allocation61_spill] sm:$0xff] %v4270_v11  ;;  %v4274_v19 = vmul.f32 %v6150_v39, %v4006_v47  ;;  %v4286_v13 = vmul.f32 %v6152_v29, %v4006_v47  ;;  %v6154_v11 = vld [vmem:[#allocation81_spill] sm:$0xff]  ;;  %v4298_v54 = vmul.f32 %v3778_v9, %v4006_v47  ;;  %v4306_v29 = vmul.f32 %v3790_v0, %v4006_v47 }
  0xf8   : > { %6144 = vst [vmem:[#allocation58_spill] sm:$0xff] %v4258_v14  ;;  %6147 = vst [vmem:[#allocation60_spill] sm:$0xff] %v4266_v44  ;;  %v6151_v14 = vld [vmem:[#allocation78_spill] sm:$0xff]  ;;  %v6153_v44 = vld [vmem:[#allocation80_spill] sm:$0xff]  ;;  %v4294_v39 = vmul.f32 %v6154_v11, %v4006_v47  ;;  %v4314_v11 = vadd.f32 %v4058_v42, %v3800_v58  ;;  %v4318_v9 = vadd.f32 %v4062_v62, %v3804_v60 }
  0xf9   : > { %v4282_v49 = vmul.f32 %v6151_v14, %v4006_v47  ;;  %v4290_v24 = vmul.f32 %v6153_v44, %v4006_v47  ;;  %v4302_v14 = vmul.f32 %v3784_v12, %v4006_v47  ;;  %v4310_v44 = vmul.f32 %v3796_v7, %v4006_v47  ;;  %v6155_v47 = vld [vmem:[#allocation82_spill] sm:$0xff]  ;;  %v6156_v42 = vld [vmem:[#allocation36_spill] sm:$0xff]  ;;  %v6157_v62 = vld [vmem:[#allocation83_spill] sm:$0xff] }
  0xfa   : > { %v4322_v12 = vadd.f32 %v4066_v53, %v3808_v52  ;;  %v4326_v0 = vadd.f32 %v4070_v51, %v3812_v56  ;;  %v4330_v7 = vadd.f32 %v4074_v50, %v3816_v61  ;;  %v4334_v58 = vadd.f32 %v4078_v41, %v3820_v63  ;;  %v6158_v53 = vld [vmem:[#allocation84_spill] sm:$0xff]  ;;  %v6159_v51 = vld [vmem:[#allocation37_spill] sm:$0xff]  ;;  %v6161_v41 = vld [vmem:[#allocation38_spill] sm:$0xff] }
  0xfb   : > { %v4338_v60 = vadd.f32 %v4082_v43, %v3824_v1  ;;  %v4342_v52 = vadd.f32 %v4086_v45, %v3828_v2  ;;  %v4346_v56 = vadd.f32 %v4090_v8, %v3832_v3  ;;  %v4350_v61 = vadd.f32 %v4094_v38, %v3836_v4  ;;  %v6160_v50 = vld [vmem:[#allocation85_spill] sm:$0xff]  ;;  %v6162_v43 = vld [vmem:[#allocation86_spill] sm:$0xff]  ;;  %v6163_v45 = vld [vmem:[#allocation39_spill] sm:$0xff] }
  0xfc   : > { %v4354_v63 = vadd.f32 %v4098_v57, %v3840_v15  ;;  %v4358_v1 = vadd.f32 %v4102_v48, %v3844_v16  ;;  %v4362_v2 = vadd.f32 %v4106_v6, %v3848_v17  ;;  %v4366_v3 = vadd.f32 %v4110_v46, %v3852_v20  ;;  %v6164_v8 = vld [vmem:[#allocation87_spill] sm:$0xff]  ;;  %v6165_v57 = vld [vmem:[#allocation88_spill] sm:$0xff]  ;;  %v6167_v46 = vld [vmem:[#allocation89_spill] sm:$0xff] }
  0xfd   : > { %v4370_v4 = vadd.f32 %v4114_v40, %v3856_v18  ;;  %v4374_v15 = vadd.f32 %v4118_v5, %v3860_v21  ;;  %v4378_v16 = vadd.f32 %v4122_v10, %v3864_v22  ;;  %v4382_v17 = vadd.f32 %v4126_v59, %v3868_v23  ;;  %v6166_v48 = vld [vmem:[#allocation40_spill] sm:$0xff]  ;;  %v6168_v40 = vld [vmem:[#allocation41_spill] sm:$0xff]  ;;  %v6169_v10 = vld [vmem:[#allocation90_spill] sm:$0xff] }
  0xfe   : > { %v4386_v20 = vadd.f32 %v4130_v55, %v3872_v25  ;;  %v4390_v18 = vadd.f32 %v4134_v37, %v3876_v26  ;;  %v4394_v21 = vadd.f32 %v6156_v42, %v6155_v47  ;;  %v4398_v22 = vadd.f32 %v4142_v36, %v6157_v62  ;;  %v6170_v59 = vld [vmem:[#allocation42_spill] sm:$0xff]  ;;  %v6171_v37 = vld [vmem:[#allocation91_spill] sm:$0xff]  ;;  %v6172_v47 = vld [vmem:[#allocation92_spill] sm:$0xff] }
  0xff   : > { %v4402_v23 = vadd.f32 %v6159_v51, %v6158_v53  ;;  %v4406_v25 = vadd.f32 %v6161_v41, %v6160_v50  ;;  %v4410_v26 = vadd.f32 %v6163_v45, %v6162_v43  ;;  %v4414_v38 = vadd.f32 %v4158_v32, %v6164_v8  ;;  %v6173_v42 = vld [vmem:[#allocation43_spill] sm:$0xff]  ;;  %v6174_v62 = vld [vmem:[#allocation93_spill] sm:$0xff]  ;;  %v6175_v53 = vld [vmem:[#allocation44_spill] sm:$0xff] }
 0x100   : > { %v4418_v6 = vadd.f32 %v6166_v48, %v6165_v57  ;;  %v4422_v5 = vadd.f32 %v6168_v40, %v6167_v46  ;;  %v4426_v55 = vadd.f32 %v6170_v59, %v6169_v10  ;;  %v4430_v36 = vadd.f32 %v4174_v28, %v6171_v37  ;;  %v6176_v50 = vld [vmem:[#allocation8_spill] sm:$0xff]  ;;  %v6177_v41 = vld [vmem:[#allocation45_spill] sm:$0xff]  ;;  %v6179_v57 = vld [vmem:[#allocation10_spill] sm:$0xff] }
 0x101   : > { %v4434_v32 = vadd.f32 %v6173_v42, %v6172_v47  ;;  %v4438_v51 = vadd.f32 %v6175_v53, %v6174_v62  ;;  %v4442_v43 = vadd.f32 %v6177_v41, %v6176_v50  ;;  %v6178_v45 = vld [vmem:[#allocation9_spill] sm:$0xff]  ;;  %v6180_v48 = vld [vmem:[#allocation46_spill] sm:$0xff]  ;;  %v6182_v46 = vld [vmem:[#allocation11_spill] sm:$0xff] }
 0x102   : > { %v4446_v8 = vadd.f32 %v4190_v35, %v6178_v45  ;;  %v4450_v28 = vadd.f32 %v6180_v48, %v6179_v57  ;;  %v6183_v40 = vld [vmem:[#allocation47_spill] sm:$0xff]  ;;  %v6184_v59 = vld [vmem:[#allocation12_spill] sm:$0xff]  ;;  %v6187_v42 = vld [vmem:[#allocation13_spill] sm:$0xff] }
 0x103   : > { %v4454_v10 = vadd.f32 %v6183_v40, %v6182_v46  ;;  %v6185_v37 = vld [vmem:[#allocation48_spill] sm:$0xff]  ;;  %v4462_v62 = vadd.f32 %v4206_v31, %v6187_v42  ;;  %v6189_v53 = vld [vmem:[#allocation14_spill] sm:$0xff]  ;;  %v6190_v50 = vld [vmem:[#allocation49_spill] sm:$0xff] }
 0x104   : > { %6181 = vst [vmem:[#allocation62_spill] sm:$0xff] %v4450_v28  ;;  %v4458_v47 = vadd.f32 %v6185_v37, %v6184_v59  ;;  %v4466_v35 = vadd.f32 %v6190_v50, %v6189_v53  ;;  %v6192_v41 = vld [vmem:[#allocation15_spill] sm:$0xff]  ;;  %v6193_v45 = vld [vmem:[#allocation50_spill] sm:$0xff]  ;;  %v6194_v48 = vld [vmem:[#allocation16_spill] sm:$0xff] }
 0x105   : > { %6188 = vst [vmem:[#allocation64_spill] sm:$0xff] %v4462_v62  ;;  %v4470_v57 = vadd.f32 %v6193_v45, %v6192_v41  ;;  %v6195_v28 = vld [vmem:[#allocation51_spill] sm:$0xff]  ;;  %v6197_v40 = vld [vmem:[#allocation17_spill] sm:$0xff]  ;;  %v6199_v37 = vld [vmem:[#allocation18_spill] sm:$0xff] }
 0x106   : > { %6186 = vst [vmem:[#allocation63_spill] sm:$0xff] %v4458_v47  ;;  %6191 = vst [vmem:[#allocation65_spill] sm:$0xff] %v4466_v35  ;;  %v4474_v46 = vadd.f32 %v6195_v28, %v6194_v48  ;;  %v4478_v59 = vadd.f32 %v4222_v27, %v6197_v40  ;;  %v6200_v47 = vld [vmem:[#allocation52_spill] sm:$0xff]  ;;  %v6202_v42 = vld [vmem:[#allocation19_spill] sm:$0xff] }
 0x107   : > { %v4482_v31 = vadd.f32 %v6200_v47, %v6199_v37  ;;  %v6203_v62 = vld [vmem:[#allocation53_spill] sm:$0xff]  ;;  %v6204_v50 = vld [vmem:[#allocation20_spill] sm:$0xff]  ;;  %v6205_v35 = vld [vmem:[#allocation54_spill] sm:$0xff] }
 0x108   : > { %6196 = vst [vmem:[#allocation66_spill] sm:$0xff] %v4474_v46  ;;  %6198 = vst [vmem:[#allocation67_spill] sm:$0xff] %v4478_v59  ;;  %v4486_v53 = vadd.f32 %v6203_v62, %v6202_v42  ;;  %v4490_v41 = vadd.f32 %v6205_v35, %v6204_v50  ;;  %v6207_v45 = vld [vmem:[#allocation21_spill] sm:$0xff]  ;;  %v6209_v48 = vld [vmem:[#allocation22_spill] sm:$0xff] }
 0x109   : > { %6201 = vst [vmem:[#allocation68_spill] sm:$0xff] %v4482_v31  ;;  %v4494_v28 = vadd.f32 %v4238_v33, %v6207_v45  ;;  %v6210_v46 = vld [vmem:[#allocation55_spill] sm:$0xff]  ;;  %v6212_v59 = vld [vmem:[#allocation56_spill] sm:$0xff]  ;;  %v6215_v31 = vld [vmem:[#allocation57_spill] sm:$0xff] }
 0x10a   : > { %6206 = vst [vmem:[#allocation69_spill] sm:$0xff] %v4490_v41  ;;  %v4498_v27 = vadd.f32 %v6210_v46, %v6209_v48  ;;  %v6211_v40 = vld [vmem:[#allocation23_spill] sm:$0xff]  ;;  %v6214_v37 = vld [vmem:[#allocation24_spill] sm:$0xff]  ;;  %v6217_v42 = vld [vmem:[#allocation25_spill] sm:$0xff]  ;;  %v4520_v48 = vpop.permute.xlu1 %1654 }
 0x10b   : > { %6208 = vst [vmem:[#allocation70_spill] sm:$0xff] %v4494_v28  ;;  %v4502_v47 = vadd.f32 %v6212_v59, %v6211_v40  ;;  %v4506_v62 = vadd.f32 %v6215_v31, %v6214_v37  ;;  %v4510_v35 = vadd.f32 %v4254_v30, %v6217_v42  ;;  %v6218_v50 = vld [vmem:[#allocation26_spill] sm:$0xff]  ;;  %v6220_v45 = vld [vmem:[#allocation27_spill] sm:$0xff]  ;;  %v6223_v59 = vld [vmem:[#allocation28_spill] sm:$0xff] }
 0x10c   : > { %v6219_v41 = vld [vmem:[#allocation58_spill] sm:$0xff]  ;;  %v6221_v28 = vld [vmem:[#allocation59_spill] sm:$0xff]  ;;  %v6224_v40 = vld [vmem:[#allocation60_spill] sm:$0xff] }
 0x10d   : > { %6213 = vst [vmem:[#allocation71_spill] sm:$0xff] %v4502_v47  ;;  %6216 = vst [vmem:[#allocation72_spill] sm:$0xff] %v4506_v62  ;;  %v4514_v33 = vadd.f32 %v6219_v41, %v6218_v50  ;;  %v4518_v46 = vadd.f32 %v6221_v28, %v6220_v45  ;;  %v4524_v47 = vadd.f32 %v6224_v40, %v6223_v59  ;;  %v6225_v31 = vld [vmem:[#allocation29_spill] sm:$0xff]  ;;  %v6227_v30 = vld [vmem:[#allocation30_spill] sm:$0xff] }
 0x10e   : > { %v6226_v37 = vld [vmem:[#allocation61_spill] sm:$0xff]  ;;  %v4532_v42 = vadd.f32 %v4274_v19, %v6227_v30  ;;  %v6228_v41 = vld [vmem:[#allocation31_spill] sm:$0xff]  ;;  %v6229_v28 = vld [vmem:[#allocation32_spill] sm:$0xff] }
 0x10f   : > { %6222 = vst [vmem:[#allocation73_spill] sm:$0xff] %v4518_v46  ;;  %v4528_v62 = vadd.f32 %v6226_v37, %v6225_v31  ;;  %v4536_v50 = vadd.f32 %v4278_v34, %v6228_v41  ;;  %v4540_v45 = vadd.f32 %v4282_v49, %v6229_v28  ;;  %v6230_v46 = vld [vmem:[#allocation33_spill] sm:$0xff]  ;;  %v6231_v40 = vld [vmem:[#allocation34_spill] sm:$0xff]  ;;  %v6232_v37 = vld [vmem:[#allocation35_spill] sm:$0xff] }
 0x110   : > { %v4544_v59 = vadd.f32 %v4286_v13, %v6230_v46  ;;  %v4548_v31 = vadd.f32 %v4290_v24, %v6231_v40  ;;  %v4552_v19 = vadd.f32 %v4294_v39, %v6232_v37  ;;  %v6233_v30 = vld [vmem:[#allocation94_spill] sm:$0xff]  ;;  %v6234_v41 = vld [vmem:[#allocation95_spill] sm:$0xff]  ;;  %v6235_v28 = vld [vmem:[#allocation96_spill] sm:$0xff]  ;;  %v4572_v39 = vadd.f32 %v4520_v48, %v4314_v11 }
 0x111   : > { %v4556_v34 = vadd.f32 %v4298_v54, %v6233_v30  ;;  %v4560_v49 = vadd.f32 %v4302_v14, %v6234_v41  ;;  %v4564_v13 = vadd.f32 %v4306_v29, %v6235_v28  ;;  %v6236_v46 = vld [vmem:[#allocation97_spill] sm:$0xff]  ;;  %v4576_v54 = vadd.f32 %v4520_v48, %v4318_v9  ;;  %v6259_v40 = vld [vmem:[#allocation62_spill] sm:$0xff]  ;;  %v6260_v37 = vld [vmem:[#allocation63_spill] sm:$0xff] }
 0x112   : > { %v4568_v24 = vadd.f32 %v4310_v44, %v6236_v46  ;;  %6237 = vst [vmem:[#allocation74_spill] sm:$0xff] %v4572_v39  ;;  %v4580_v14 = vadd.f32 %v4520_v48, %v4322_v12  ;;  %v4584_v29 = vadd.f32 %v4520_v48, %v4326_v0  ;;  %v4588_v44 = vadd.f32 %v4520_v48, %v4330_v7  ;;  %v6261_v30 = vld [vmem:[#allocation64_spill] sm:$0xff]  ;;  %v6262_v41 = vld [vmem:[#allocation65_spill] sm:$0xff]  ;;  %v6264_v46 = vld [vmem:[#allocation66_spill] sm:$0xff] }
 0x113   : > { %6238 = vst [vmem:[#allocation75_spill] sm:$0xff] %v4576_v54  ;;  %v4592_v11 = vadd.f32 %v4520_v48, %v4334_v58  ;;  %v4596_v9 = vadd.f32 %v4520_v48, %v4338_v60  ;;  %v4600_v12 = vadd.f32 %v4520_v48, %v4342_v52  ;;  %v4604_v0 = vadd.f32 %v4520_v48, %v4346_v56  ;;  %v6267_v54 = vld [vmem:[#allocation68_spill] sm:$0xff]  ;;  %v6269_v39 = vld [vmem:[#allocation69_spill] sm:$0xff] }
 0x114   : > { %6239 = vst [vmem:[#allocation76_spill] sm:$0xff] %v4588_v44  ;;  %v4608_v7 = vadd.f32 %v4520_v48, %v4350_v61  ;;  %v4612_v58 = vadd.f32 %v4520_v48, %v4354_v63  ;;  %v4616_v60 = vadd.f32 %v4520_v48, %v4358_v1  ;;  %v4620_v52 = vadd.f32 %v4520_v48, %v4362_v2 }
 0x115   : > { %6240 = vst [vmem:[#allocation77_spill] sm:$0xff] %v4592_v11  ;;  %6241 = vst [vmem:[#allocation78_spill] sm:$0xff] %v4596_v9  ;;  %v4624_v56 = vadd.f32 %v4520_v48, %v4366_v3  ;;  %v4628_v61 = vadd.f32 %v4520_v48, %v4370_v4  ;;  %v4632_v63 = vadd.f32 %v4520_v48, %v4374_v15 }
 0x116   : > { %6242 = vst [vmem:[#allocation79_spill] sm:$0xff] %v4600_v12  ;;  %6243 = vst [vmem:[#allocation80_spill] sm:$0xff] %v4604_v0  ;;  %v4636_v1 = vadd.f32 %v4520_v48, %v4378_v16  ;;  %v4640_v2 = vadd.f32 %v4520_v48, %v4382_v17  ;;  %v4644_v3 = vadd.f32 %v4520_v48, %v4386_v20 }
 0x117   : > { %6244 = vst [vmem:[#allocation81_spill] sm:$0xff] %v4608_v7  ;;  %6245 = vst [vmem:[#allocation82_spill] sm:$0xff] %v4612_v58  ;;  %v4648_v4 = vadd.f32 %v4520_v48, %v4390_v18  ;;  %v4652_v15 = vadd.f32 %v4520_v48, %v4394_v21  ;;  %v4656_v16 = vadd.f32 %v4520_v48, %v4398_v22 }
 0x118   : > { %6246 = vst [vmem:[#allocation36_spill] sm:$0xff] %v4616_v60  ;;  %6247 = vst [vmem:[#allocation83_spill] sm:$0xff] %v4624_v56  ;;  %v4660_v17 = vadd.f32 %v4520_v48, %v4402_v23  ;;  %v4664_v20 = vadd.f32 %v4520_v48, %v4406_v25  ;;  %v4668_v18 = vadd.f32 %v4520_v48, %v4410_v26 }
 0x119   : > { %6248 = vst [vmem:[#allocation84_spill] sm:$0xff] %v4628_v61  ;;  %6249 = vst [vmem:[#allocation37_spill] sm:$0xff] %v4640_v2  ;;  %v4672_v21 = vadd.f32 %v4520_v48, %v4414_v38  ;;  %v4676_v22 = vadd.f32 %v4520_v48, %v4418_v6  ;;  %v4680_v23 = vadd.f32 %v4520_v48, %v4422_v5 }
 0x11a   : > { %6250 = vst [vmem:[#allocation85_spill] sm:$0xff] %v4648_v4  ;;  %6251 = vst [vmem:[#allocation38_spill] sm:$0xff] %v4656_v16  ;;  %v4684_v25 = vadd.f32 %v4520_v48, %v4426_v55  ;;  %v4688_v26 = vadd.f32 %v4520_v48, %v4430_v36  ;;  %v4692_v38 = vadd.f32 %v4520_v48, %v4434_v32 }
 0x11b   : > { %6252 = vst [vmem:[#allocation86_spill] sm:$0xff] %v4664_v20  ;;  %6253 = vst [vmem:[#allocation39_spill] sm:$0xff] %v4672_v21  ;;  %v4696_v6 = vadd.f32 %v4520_v48, %v4438_v51  ;;  %v4700_v5 = vadd.f32 %v4520_v48, %v4442_v43  ;;  %v4704_v55 = vadd.f32 %v4520_v48, %v4446_v8 }
 0x11c   : > { %6254 = vst [vmem:[#allocation87_spill] sm:$0xff] %v4684_v25  ;;  %6255 = vst [vmem:[#allocation88_spill] sm:$0xff] %v4688_v26  ;;  %v4708_v36 = vadd.f32 %v4520_v48, %v6259_v40  ;;  %v4712_v32 = vadd.f32 %v4520_v48, %v4454_v10  ;;  %v4716_v51 = vadd.f32 %v4520_v48, %v6260_v37  ;;  %v6266_v40 = vld [vmem:[#allocation67_spill] sm:$0xff] }
 0x11d   : > { %6256 = vst [vmem:[#allocation40_spill] sm:$0xff] %v4692_v38  ;;  %6257 = vst [vmem:[#allocation89_spill] sm:$0xff] %v4696_v6  ;;  %v4720_v43 = vadd.f32 %v4520_v48, %v6261_v30  ;;  %v4724_v8 = vadd.f32 %v4520_v48, %v6262_v41  ;;  %v4728_v28 = vadd.f32 %v4520_v48, %v4470_v57 }
 0x11e   : > { %6258 = vst [vmem:[#allocation41_spill] sm:$0xff] %v4700_v5  ;;  %v4732_v10 = vadd.f32 %v4520_v48, %v6264_v46  ;;  %v4736_v37 = vadd.f32 %v4520_v48, %v6266_v40  ;;  %v4740_v30 = vadd.f32 %v4520_v48, %v6267_v54  ;;  %v4744_v41 = vadd.f32 %v4520_v48, %v4486_v53 }
 0x11f   : > { %6263 = vst [vmem:[#allocation90_spill] sm:$0xff] %v4724_v8  ;;  %v4748_v57 = vadd.f32 %v4520_v48, %v6269_v39  ;;  %v6271_v8 = vld [vmem:[#allocation70_spill] sm:$0xff]  ;;  %v4756_v40 = vadd.f32 %v4520_v48, %v4498_v27  ;;  %v4768_v39 = vadd.f32 %v4520_v48, %v4510_v35  ;;  %v4788_v35 = vadd.f32 %v4520_v48, %v4532_v42 }
 0x120   : > { %6265 = vst [vmem:[#allocation42_spill] sm:$0xff] %v4732_v10  ;;  %6268 = vst [vmem:[#allocation91_spill] sm:$0xff] %v4740_v30  ;;  %v4752_v46 = vadd.f32 %v4520_v48, %v6271_v8  ;;  %v6272_v10 = vld [vmem:[#allocation71_spill] sm:$0xff]  ;;  %v6273_v30 = vld [vmem:[#allocation72_spill] sm:$0xff]  ;;  %v4772_v8 = vadd.f32 %v4520_v48, %v4514_v33  ;;  %v4792_v33 = vadd.f32 %v4520_v48, %v4536_v50 }
 0x121   : > { %6270 = vst [vmem:[#allocation92_spill] sm:$0xff] %v4748_v57  ;;  %v4760_v54 = vadd.f32 %v4520_v48, %v6272_v10  ;;  %v4764_v53 = vadd.f32 %v4520_v48, %v6273_v30  ;;  %v6274_v57 = vld [vmem:[#allocation73_spill] sm:$0xff]  ;;  %v4780_v10 = vadd.f32 %v4520_v48, %v4524_v47  ;;  %v4784_v30 = vadd.f32 %v4520_v48, %v4528_v62 }
 0x122   : > { %v4776_v27 = vadd.f32 %v4520_v48, %v6274_v57  ;;  %v4796_v57 = vadd.f32 %v4520_v48, %v4540_v45  ;;  %v4800_v47 = vadd.f32 %v4520_v48, %v4544_v59  ;;  %v4804_v62 = vadd.f32 %v4520_v48, %v4548_v31 }
 0x123   : > { %v4808_v42 = vadd.f32 %v4520_v48, %v4552_v19  ;;  %v4812_v50 = vadd.f32 %v4520_v48, %v4556_v34  ;;  %v4816_v45 = vadd.f32 %v4520_v48, %v4560_v49  ;;  %v4820_v59 = vadd.f32 %v4520_v48, %v4564_v13 }
 0x124   : > { %v4824_v31 = vadd.f32 %v4520_v48, %v4568_v24  ;;  %v1786_v19 = vcombine.low %v4580_v14, %v4584_v29  ;;  %v1787_v34 = vcombine.low %v4588_v44, %v4592_v11  ;;  %v1788_v49 = vcombine.low %v4596_v9, %v4600_v12 }
 0x125   : > { %6275 = vst [vmem:[#allocation43_spill] sm:$0xff] %v4812_v50  ;;  %v1789_v50 = vcombine.low %v4604_v0, %v4608_v7  ;;  %v1790_v13 = vcombine.low %v4612_v58, %v4616_v60  ;;  %v1791_v48 = vcombine.low %v4620_v52, %v4624_v56  ;;  %v1792_v24 = vcombine.low %v4628_v61, %v4632_v63 }
 0x126   : > { %v1793_v11 = vcombine.low %v4636_v1, %v4640_v2  ;;  %v1794_v12 = vcombine.low %v4644_v3, %v4648_v4  ;;  %v1795_v7 = vcombine.low %v4652_v15, %v4656_v16  ;;  %v1796_v60 = vcombine.low %v4660_v17, %v4664_v20  ;;  %1850 = vst [vmem:[%s2684_s16 + $0x8] sm:$0xff] %v1786_v19 }
 0x127   : > { %v1797_v56 = vcombine.low %v4668_v18, %v4672_v21  ;;  %1851 = vst [vmem:[%s2684_s16 + $0x10] sm:$0xff] %v1787_v34  ;;  %1852 = vst [vmem:[%s2684_s16 + $0x18] sm:$0xff] %v1788_v49  ;;  %v1798_v4 = vcombine.low %v4676_v22, %v4680_v23  ;;  %v1799_v16 = vcombine.low %v4684_v25, %v4688_v26  ;;  %v6276_v34 = vld [vmem:[#allocation90_spill] sm:$0xff] }
 0x128   : > { %1853 = vst [vmem:[%s2684_s16 + $0x20] sm:$0xff] %v1789_v50  ;;  %v1800_v20 = vcombine.low %v4692_v38, %v4696_v6  ;;  %v1801_v21 = vcombine.low %v4700_v5, %v4704_v55  ;;  %1854 = vst [vmem:[%s2684_s16 + $0x28] sm:$0xff] %v1790_v13  ;;  %v1802_v50 = vcombine.low %v4708_v36, %v4712_v32  ;;  %v6277_v6 = vld [vmem:[#allocation42_spill] sm:$0xff] }
 0x129   : > { %1855 = vst [vmem:[%s2684_s16 + $0x30] sm:$0xff] %v1791_v48  ;;  %1856 = vst [vmem:[%s2684_s16 + $0x38] sm:$0xff] %v1792_v24  ;;  %v1803_v19 = vcombine.low %v4716_v51, %v4720_v43  ;;  %v1804_v49 = vcombine.low %v6276_v34, %v4728_v28  ;;  %v1805_v5 = vcombine.low %v6277_v6, %v4736_v37  ;;  %v6279_v48 = vld [vmem:[#allocation92_spill] sm:$0xff] }
 0x12a   : > { %1857 = vst [vmem:[%s2684_s16 + $0x40] sm:$0xff] %v1793_v11  ;;  %1858 = vst [vmem:[%s2684_s16 + $0x48] sm:$0xff] %v1794_v12  ;;  %v6278_v11 = vld [vmem:[#allocation91_spill] sm:$0xff]  ;;  %v1807_v24 = vcombine.low %v6279_v48, %v4752_v46  ;;  %v1808_v38 = vcombine.low %v4756_v40, %v4760_v54  ;;  %v1809_v26 = vcombine.low %v4764_v53, %v4768_v39 }
 0x12b   : > { %1859 = vst [vmem:[%s2684_s16 + $0x50] sm:$0xff] %v1795_v7  ;;  %1860 = vst [vmem:[%s2684_s16 + $0x58] sm:$0xff] %v1796_v60  ;;  %v1806_v13 = vcombine.low %v6278_v11, %v4744_v41  ;;  %v1810_v12 = vcombine.low %v4772_v8, %v4776_v27  ;;  %v1811_v7 = vcombine.low %v4780_v10, %v4784_v30 }
 0x12c   : > { %1861 = vst [vmem:[%s2684_s16 + $0x60] sm:$0xff] %v1797_v56  ;;  %1862 = vst [vmem:[%s2684_s16 + $0x68] sm:$0xff] %v1798_v4  ;;  %v1812_v60 = vcombine.low %v4788_v35, %v4792_v33  ;;  %v1813_v56 = vcombine.low %v4796_v57, %v4800_v47  ;;  %v1814_v4 = vcombine.low %v4804_v62, %v4808_v42 }
 0x12d   : > { %1863 = vst [vmem:[%s2684_s16 + $0x70] sm:$0xff] %v1799_v16  ;;  %1864 = vst [vmem:[%s2684_s16 + $0x78] sm:$0xff] %v1800_v20  ;;  %v6280_v16 = vld [vmem:[#allocation43_spill] sm:$0xff] }
 0x12e   : > { %1865 = vst [vmem:[%s2684_s16 + $0x80] sm:$0xff] %v1801_v21  ;;  %1866 = vst [vmem:[%s2684_s16 + $0x88] sm:$0xff] %v1802_v50  ;;  %v1815_v20 = vcombine.low %v6280_v16, %v4816_v45  ;;  %v1816_v21 = vcombine.low %v4820_v59, %v4824_v31  ;;  %v6281_v50 = vld [vmem:[#allocation74_spill] sm:$0xff] }
 0x12f   : > { %1867 = vst [vmem:[%s2684_s16 + $0x90] sm:$0xff] %v1803_v19  ;;  %1868 = vst [vmem:[%s2684_s16 + $0x98] sm:$0xff] %v1804_v49  ;;  %v1883_v19 = vsel %vm1882_vm1, %v6281_v50, 0.0 }
 0x130   : > { %1869 = vst [vmem:[%s2684_s16 + $0xa0] sm:$0xff] %v1805_v5  ;;  %1870 = vst [vmem:[%s2684_s16 + $0xa8] sm:$0xff] %v1806_v13  ;;  %v6282_v5 = vld [vmem:[#allocation75_spill] sm:$0xff]  ;;  %v1886_v13 = vsel %vm1882_vm1, %v4580_v14, 0.0 }
 0x131   : > { %1871 = vst [vmem:[%s2684_s16 + $0xb0] sm:$0xff] %v1807_v24  ;;  %1872 = vst [vmem:[%s2684_s16 + $0xb8] sm:$0xff] %v1808_v38  ;;  %v1884_v49 = vsel %vm1882_vm1, %v6282_v5, 0.0  ;;  %v1890_v38 = vsel %vm1882_vm1, %v4588_v44, 0.0  ;;  %v6286_v44 = vld [vmem:[#allocation36_spill] sm:$0xff] }
 0x132   : > { %1873 = vst [vmem:[%s2684_s16 + $0xc0] sm:$0xff] %v1809_v26  ;;  %1874 = vst [vmem:[%s2684_s16 + $0xc8] sm:$0xff] %v1810_v12  ;;  %v1885_v25 = vadd.f32 %v1884_v49, %v1883_v19  ;;  %v1888_v26 = vsel %vm1882_vm1, %v4584_v29, 0.0  ;;  %v6283_v12 = vld [vmem:[#allocation77_spill] sm:$0xff]  ;;  %v1902_v49 = vsel %vm1882_vm1, %v4612_v58, 0.0  ;;  %v4959_v58 = vsel %vm1882_vm1, %v4632_v63, 0.0 }
 0x133   : > { %1875 = vst [vmem:[%s2684_s16 + $0xd0] sm:$0xff] %v1811_v7  ;;  %1876 = vst [vmem:[%s2684_s16 + $0xd8] sm:$0xff] %v1812_v60  ;;  %v1892_v7 = vsel %vm1882_vm1, %v6283_v12, 0.0  ;;  %v1894_v60 = vsel %vm1882_vm1, %v4596_v9, 0.0  ;;  %v4947_v9 = vsel %vm1882_vm1, %v4620_v52, 0.0  ;;  %v6287_v12 = vld [vmem:[#allocation83_spill] sm:$0xff] }
 0x134   : > { %1877 = vst [vmem:[%s2684_s16 + $0xe0] sm:$0xff] %v1813_v56  ;;  %1878 = vst [vmem:[%s2684_s16 + $0xe8] sm:$0xff] %v1814_v4  ;;  %v1887_v24 = vadd.f32 %v1886_v13, %v1885_v25  ;;  %v6284_v56 = vld [vmem:[#allocation79_spill] sm:$0xff]  ;;  %v4943_v25 = vsel %vm1882_vm1, %v6286_v44, 0.0  ;;  %v4963_v44 = vsel %vm1882_vm1, %v4636_v1, 0.0 }
 0x135   : > { %1879 = vst [vmem:[%s2684_s16 + $0xf0] sm:$0xff] %v1815_v20  ;;  %1880 = vst [vmem:[%s2684_s16 + $0xf8] sm:$0xff] %v1816_v21  ;;  %v1896_v4 = vsel %vm1882_vm1, %v6284_v56, 0.0  ;;  %v1898_v20 = vsel %vm1882_vm1, %v4604_v0, 0.0  ;;  %v6285_v21 = vld [vmem:[#allocation81_spill] sm:$0xff]  ;;  %v4951_v56 = vsel %vm1882_vm1, %v6287_v12, 0.0 }
 0x136   : > { %v1900_v19 = vsel %vm1882_vm1, %v6285_v21, 0.0  ;;  %v1889_v13 = vadd.f32 %v1888_v26, %v1887_v24  ;;  %6288 = vst [vmem:[#allocation93_spill] sm:$0xff] %v4951_v56  ;;  %v4955_v0 = vsel %vm1882_vm1, %v4628_v61, 0.0  ;;  %6290 = vst [vmem:[#allocation8_spill] sm:$0xff] %v4959_v58  ;;  %v4967_v26 = vsel %vm1882_vm1, %v4640_v2, 0.0  ;;  %v6294_v12 = vld [vmem:[#allocation85_spill] sm:$0xff] }
 0x137   : > { %6289 = vst [vmem:[#allocation44_spill] sm:$0xff] %v4955_v0  ;;  %6291 = vst [vmem:[#allocation45_spill] sm:$0xff] %v4963_v44  ;;  %v4971_v24 = vsel %vm1882_vm1, %v4644_v3, 0.0  ;;  %v4975_v61 = vsel %vm1882_vm1, %v6294_v12, 0.0  ;;  %v4979_v58 = vsel %vm1882_vm1, %v4652_v15, 0.0  ;;  %v6297_v0 = vld [vmem:[#allocation38_spill] sm:$0xff] }
 0x138   : > { %6292 = vst [vmem:[#allocation9_spill] sm:$0xff] %v4967_v26  ;;  %6293 = vst [vmem:[#allocation10_spill] sm:$0xff] %v4971_v24  ;;  %v1891_v56 = vadd.f32 %v1890_v38, %v1889_v13  ;;  %v4983_v44 = vsel %vm1882_vm1, %v6297_v0, 0.0  ;;  %v4987_v26 = vsel %vm1882_vm1, %v4660_v17, 0.0  ;;  %v6300_v2 = vld [vmem:[#allocation86_spill] sm:$0xff]  ;;  %v4995_v38 = vsel %vm1882_vm1, %v4668_v18, 0.0 }
 0x139   : > { %6295 = vst [vmem:[#allocation46_spill] sm:$0xff] %v4975_v61  ;;  %6296 = vst [vmem:[#allocation11_spill] sm:$0xff] %v4979_v58  ;;  %v4991_v24 = vsel %vm1882_vm1, %v6300_v2, 0.0  ;;  %v6303_v13 = vld [vmem:[#allocation39_spill] sm:$0xff] }
 0x13a   : > { %6298 = vst [vmem:[#allocation47_spill] sm:$0xff] %v4983_v44  ;;  %6299 = vst [vmem:[#allocation12_spill] sm:$0xff] %v4987_v26  ;;  %v4999_v61 = vsel %vm1882_vm1, %v6303_v13, 0.0  ;;  %v1893_v58 = vadd.f32 %v1892_v7, %v1891_v56  ;;  %v5003_v44 = vsel %vm1882_vm1, %v4704_v55, 0.0  ;;  %v5007_v26 = vsel %vm1882_vm1, %v4708_v36, 0.0 }
 0x13b   : > { %6301 = vst [vmem:[#allocation48_spill] sm:$0xff] %v4991_v24  ;;  %6302 = vst [vmem:[#allocation13_spill] sm:$0xff] %v4995_v38  ;;  %v5011_v24 = vsel %vm1882_vm1, %v4712_v32, 0.0  ;;  %v5015_v38 = vsel %vm1882_vm1, %v4716_v51, 0.0  ;;  %v5023_v7 = vsel %vm1882_vm1, %v6276_v34, 0.0  ;;  %v5027_v56 = vsel %vm1882_vm1, %v4728_v28, 0.0 }
 0x13c   : > { %6304 = vst [vmem:[#allocation14_spill] sm:$0xff] %v4999_v61  ;;  %6305 = vst [vmem:[#allocation49_spill] sm:$0xff] %v5003_v44  ;;  %v5019_v61 = vsel %vm1882_vm1, %v4720_v43, 0.0  ;;  %v5154_v44 = vmul.f32 %v4580_v14, %v4580_v14  ;;  %v6347_v14 = vld [vmem:[#allocation79_spill] sm:$0xff] }
 0x13d   : > { %6306 = vst [vmem:[#allocation15_spill] sm:$0xff] %v5007_v26  ;;  %6307 = vst [vmem:[#allocation50_spill] sm:$0xff] %v5011_v24  ;;  %v1895_v26 = vadd.f32 %v1894_v60, %v1893_v58  ;;  %v5031_v24 = vsel %vm1882_vm1, %v6277_v6, 0.0  ;;  %v5051_v58 = vsel %vm1882_vm1, %v4752_v46, 0.0  ;;  %v5055_v60 = vsel %vm1882_vm1, %v4756_v40, 0.0 }
 0x13e   : > { %6308 = vst [vmem:[#allocation16_spill] sm:$0xff] %v5015_v38  ;;  %6309 = vst [vmem:[#allocation51_spill] sm:$0xff] %v5019_v61  ;;  %v5035_v38 = vsel %vm1882_vm1, %v4736_v37, 0.0  ;;  %v5039_v61 = vsel %vm1882_vm1, %v6278_v11, 0.0 }
 0x13f   : > { %6310 = vst [vmem:[#allocation17_spill] sm:$0xff] %v5023_v7  ;;  %6311 = vst [vmem:[#allocation18_spill] sm:$0xff] %v5027_v56  ;;  %v5043_v7 = vsel %vm1882_vm1, %v4744_v41, 0.0  ;;  %v5047_v56 = vsel %vm1882_vm1, %v6279_v48, 0.0 }
 0x140   : > { %6312 = vst [vmem:[#allocation52_spill] sm:$0xff] %v5031_v24  ;;  %6313 = vst [vmem:[#allocation19_spill] sm:$0xff] %v5035_v38  ;;  %v1897_v38 = vadd.f32 %v1896_v4, %v1895_v26  ;;  %v5079_v4 = vsel %vm1882_vm1, %v4780_v10, 0.0  ;;  %v5083_v26 = vsel %vm1882_vm1, %v4784_v30, 0.0  ;;  %v5149_v24 = vmul.f32 %v6282_v5, %v6282_v5 }
 0x141   : > { %6314 = vst [vmem:[#allocation53_spill] sm:$0xff] %v5039_v61  ;;  %6315 = vst [vmem:[#allocation20_spill] sm:$0xff] %v5043_v7  ;;  %v5059_v61 = vsel %vm1882_vm1, %v4760_v54, 0.0  ;;  %v5063_v7 = vsel %vm1882_vm1, %v4764_v53, 0.0 }
 0x142   : > { %6316 = vst [vmem:[#allocation54_spill] sm:$0xff] %v5047_v56  ;;  %6317 = vst [vmem:[#allocation21_spill] sm:$0xff] %v5051_v58  ;;  %v5067_v56 = vsel %vm1882_vm1, %v4768_v39, 0.0  ;;  %v5071_v58 = vsel %vm1882_vm1, %v4772_v8, 0.0 }
 0x143   : > { %6318 = vst [vmem:[#allocation22_spill] sm:$0xff] %v5055_v60  ;;  %6319 = vst [vmem:[#allocation55_spill] sm:$0xff] %v5059_v61  ;;  %v5075_v60 = vsel %vm1882_vm1, %v4776_v27, 0.0 }
 0x144   : > { %6320 = vst [vmem:[#allocation23_spill] sm:$0xff] %v5063_v7  ;;  %6321 = vst [vmem:[#allocation56_spill] sm:$0xff] %v5067_v56  ;;  %v1899_v7 = vadd.f32 %v1898_v20, %v1897_v38  ;;  %v5087_v56 = vsel %vm1882_vm1, %v4788_v35, 0.0  ;;  %v5103_v20 = vsel %vm1882_vm1, %v4804_v62, 0.0  ;;  %v5107_v38 = vsel %vm1882_vm1, %v4808_v42, 0.0 }
 0x145   : > { %6322 = vst [vmem:[#allocation24_spill] sm:$0xff] %v5071_v58  ;;  %6323 = vst [vmem:[#allocation57_spill] sm:$0xff] %v5075_v60  ;;  %v5091_v58 = vsel %vm1882_vm1, %v4792_v33, 0.0  ;;  %v5095_v60 = vsel %vm1882_vm1, %v4796_v57, 0.0 }
 0x146   : > { %6324 = vst [vmem:[#allocation25_spill] sm:$0xff] %v5079_v4  ;;  %6325 = vst [vmem:[#allocation26_spill] sm:$0xff] %v5083_v26  ;;  %v5099_v4 = vsel %vm1882_vm1, %v4800_v47, 0.0  ;;  %v6340_v26 = vld [vmem:[#allocation88_spill] sm:$0xff] }
 0x147   : > { %6326 = vst [vmem:[#allocation58_spill] sm:$0xff] %v5087_v56  ;;  %6327 = vst [vmem:[#allocation27_spill] sm:$0xff] %v5091_v58  ;;  %v5111_v58 = vsel %vm1882_vm1, %v6280_v16, 0.0  ;;  %v1901_v56 = vadd.f32 %v1900_v19, %v1899_v7  ;;  %v6338_v19 = vld [vmem:[#allocation87_spill] sm:$0xff]  ;;  %v5141_v61 = vsel %vm1882_vm1, %v6340_v26, 0.0 }
 0x148   : > { %6328 = vst [vmem:[#allocation59_spill] sm:$0xff] %v5095_v60  ;;  %6329 = vst [vmem:[#allocation28_spill] sm:$0xff] %v5099_v4  ;;  %v5115_v60 = vsel %vm1882_vm1, %v4816_v45, 0.0  ;;  %v5119_v4 = vsel %vm1882_vm1, %v4820_v59, 0.0  ;;  %v5135_v7 = vsel %vm1882_vm1, %v6338_v19, 0.0 }
 0x149   : > { %6330 = vst [vmem:[#allocation60_spill] sm:$0xff] %v5103_v20  ;;  %6331 = vst [vmem:[#allocation29_spill] sm:$0xff] %v5107_v38  ;;  %v5123_v20 = vsel %vm1882_vm1, %v4824_v31, 0.0  ;;  %v5127_v38 = vsel %vm1882_vm1, %v4676_v22, 0.0 }
 0x14a   : > { %6332 = vst [vmem:[#allocation61_spill] sm:$0xff] %v5111_v58  ;;  %6333 = vst [vmem:[#allocation30_spill] sm:$0xff] %v5115_v60  ;;  %v5131_v58 = vsel %vm1882_vm1, %v4680_v23, 0.0  ;;  %v1785_v60 = vcombine.low %v6281_v50, %v6282_v5 }
 0x14b   : > { %6334 = vst [vmem:[#allocation31_spill] sm:$0xff] %v5119_v4  ;;  %6335 = vst [vmem:[#allocation32_spill] sm:$0xff] %v5123_v20  ;;  %v1903_v4 = vadd.f32 %v1902_v49, %v1901_v56  ;;  %v5145_v20 = vmul.f32 %v6281_v50, %v6281_v50  ;;  %v5158_v49 = vmul.f32 %v4584_v29, %v4584_v29  ;;  %v6343_v56 = vld [vmem:[#allocation76_spill] sm:$0xff] }
 0x14c   : > { %6336 = vst [vmem:[#allocation33_spill] sm:$0xff] %v5127_v38  ;;  %6337 = vst [vmem:[#allocation34_spill] sm:$0xff] %v5131_v58  ;;  %v6346_v58 = vld [vmem:[#allocation78_spill] sm:$0xff]  ;;  %v5175_v38 = vmul.f32 %v6347_v14, %v6347_v14  ;;  %v6348_v29 = vld [vmem:[#allocation80_spill] sm:$0xff] }
 0x14d   : > { %6339 = vst [vmem:[#allocation35_spill] sm:$0xff] %v5135_v7  ;;  %6341 = vst [vmem:[#allocation94_spill] sm:$0xff] %v5141_v61  ;;  %v5162_v61 = vmul.f32 %v6343_v56, %v6343_v56  ;;  %v6344_v7 = vld [vmem:[#allocation77_spill] sm:$0xff]  ;;  %v1905_v5 = vadd.f32 %v4943_v25, %v1903_v4  ;;  %v5183_v56 = vmul.f32 %v6285_v21, %v6285_v21  ;;  %v6351_v25 = vld [vmem:[#allocation36_spill] sm:$0xff] }
 0x14e   : > { %1849 = vst [vmem:[%s2684_s16] sm:$0xff] %v1785_v60  ;;  %6342 = vst [vmem:[#allocation95_spill] sm:$0xff] %v5158_v49  ;;  %v5166_v50 = vmul.f32 %v6344_v7, %v6344_v7  ;;  %v5171_v60 = vmul.f32 %v6346_v58, %v6346_v58  ;;  %v5179_v49 = vmul.f32 %v6348_v29, %v6348_v29  ;;  %v6350_v7 = vld [vmem:[#allocation82_spill] sm:$0xff]  ;;  %v6354_v29 = vld [vmem:[#allocation83_spill] sm:$0xff] }
 0x14f   : > { %v5191_v58 = vmul.f32 %v6351_v25, %v6351_v25  ;;  %v5195_v4 = vmul.f32 %v4620_v52, %v4620_v52  ;;  %v1907_v14 = vadd.f32 %v4947_v9, %v1905_v5  ;;  %v5204_v21 = vmul.f32 %v4632_v63, %v4632_v63  ;;  %v6356_v25 = vld [vmem:[#allocation37_spill] sm:$0xff] }
 0x150   : > { %6345 = vst [vmem:[#allocation96_spill] sm:$0xff] %v5166_v50  ;;  %6349 = vst [vmem:[#allocation97_spill] sm:$0xff] %v5179_v49  ;;  %v5187_v50 = vmul.f32 %v6350_v7, %v6350_v7  ;;  %v5200_v49 = vmul.f32 %v6354_v29, %v6354_v29  ;;  %v5208_v7 = vmul.f32 %v4636_v1, %v4636_v1  ;;  %v6357_v5 = vld [vmem:[#allocation93_spill] sm:$0xff] }
 0x151   : > { %6352 = vst [vmem:[#allocation62_spill] sm:$0xff] %v5191_v58  ;;  %6353 = vst [vmem:[#allocation63_spill] sm:$0xff] %v5195_v4  ;;  %v5212_v58 = vmul.f32 %v6356_v25, %v6356_v25  ;;  %v5216_v52 = vmul.f32 %v4644_v3, %v4644_v3  ;;  %v5220_v9 = vmul.f32 %v6294_v12, %v6294_v12 }
 0x152   : > { %6355 = vst [vmem:[#allocation64_spill] sm:$0xff] %v5200_v49  ;;  %v5224_v63 = vmul.f32 %v4652_v15, %v4652_v15  ;;  %v1909_v29 = vadd.f32 %v6357_v5, %v1907_v14  ;;  %v5229_v1 = vmul.f32 %v6297_v0, %v6297_v0  ;;  %v5233_v25 = vmul.f32 %v4660_v17, %v4660_v17  ;;  %v6359_v14 = vld [vmem:[#allocation44_spill] sm:$0xff] }
 0x153   : > { %v5237_v3 = vmul.f32 %v6300_v2, %v6300_v2  ;;  %v5241_v12 = vmul.f32 %v4668_v18, %v4668_v18  ;;  %v5245_v15 = vmul.f32 %v6303_v13, %v6303_v13  ;;  %v5249_v0 = vmul.f32 %v4676_v22, %v4676_v22  ;;  %v6360_v13 = vld [vmem:[#allocation40_spill] sm:$0xff]  ;;  %v6361_v22 = vld [vmem:[#allocation89_spill] sm:$0xff] }
 0x154   : > { %v5253_v17 = vmul.f32 %v4680_v23, %v4680_v23  ;;  %v1911_v5 = vadd.f32 %v6359_v14, %v1909_v29  ;;  %v5258_v2 = vmul.f32 %v6338_v19, %v6338_v19  ;;  %v5262_v18 = vmul.f32 %v6340_v26, %v6340_v26  ;;  %v6362_v23 = vld [vmem:[#allocation41_spill] sm:$0xff]  ;;  %v6363_v29 = vld [vmem:[#allocation8_spill] sm:$0xff] }
 0x155   : > { %v5266_v49 = vmul.f32 %v6360_v13, %v6360_v13  ;;  %v5270_v4 = vmul.f32 %v6361_v22, %v6361_v22  ;;  %v5278_v19 = vmul.f32 %v4704_v55, %v4704_v55  ;;  %v5282_v26 = vmul.f32 %v4708_v36, %v4708_v36 }
 0x156   : > { %6358 = vst [vmem:[#allocation65_spill] sm:$0xff] %v5253_v17  ;;  %v5274_v17 = vmul.f32 %v6362_v23, %v6362_v23  ;;  %v1913_v14 = vadd.f32 %v6363_v29, %v1911_v5  ;;  %v5287_v13 = vmul.f32 %v4712_v32, %v4712_v32  ;;  %v5291_v22 = vmul.f32 %v4716_v51, %v4716_v51  ;;  %v6364_v5 = vld [vmem:[#allocation45_spill] sm:$0xff] }
 0x157   : > { %v5295_v23 = vmul.f32 %v4720_v43, %v4720_v43  ;;  %v5299_v55 = vmul.f32 %v6276_v34, %v6276_v34  ;;  %v5303_v36 = vmul.f32 %v4728_v28, %v4728_v28  ;;  %v5307_v32 = vmul.f32 %v6277_v6, %v6277_v6 }
 0x158   : > { %v5311_v51 = vmul.f32 %v4736_v37, %v4736_v37  ;;  %v1915_v29 = vadd.f32 %v6364_v5, %v1913_v14  ;;  %v5316_v43 = vmul.f32 %v6278_v11, %v6278_v11  ;;  %v5320_v34 = vmul.f32 %v4744_v41, %v4744_v41  ;;  %v6365_v14 = vld [vmem:[#allocation9_spill] sm:$0xff] }
 0x159   : > { %v5324_v28 = vmul.f32 %v6279_v48, %v6279_v48  ;;  %v5328_v6 = vmul.f32 %v4752_v46, %v4752_v46  ;;  %v5332_v37 = vmul.f32 %v4756_v40, %v4756_v40  ;;  %v5336_v11 = vmul.f32 %v4760_v54, %v4760_v54 }
 0x15a   : > { %v5340_v41 = vmul.f32 %v4764_v53, %v4764_v53  ;;  %v1917_v5 = vadd.f32 %v6365_v14, %v1915_v29  ;;  %v5345_v48 = vmul.f32 %v4768_v39, %v4768_v39  ;;  %v5349_v46 = vmul.f32 %v4772_v8, %v4772_v8  ;;  %v6366_v29 = vld [vmem:[#allocation10_spill] sm:$0xff] }
 0x15b   : > { %v5353_v40 = vmul.f32 %v4776_v27, %v4776_v27  ;;  %v5357_v54 = vmul.f32 %v4780_v10, %v4780_v10  ;;  %v5361_v53 = vmul.f32 %v4784_v30, %v4784_v30  ;;  %v5365_v39 = vmul.f32 %v4788_v35, %v4788_v35 }
 0x15c   : > { %v5369_v8 = vmul.f32 %v4792_v33, %v4792_v33  ;;  %v1919_v14 = vadd.f32 %v6366_v29, %v1917_v5  ;;  %v5374_v27 = vmul.f32 %v4796_v57, %v4796_v57  ;;  %v5378_v10 = vmul.f32 %v4800_v47, %v4800_v47  ;;  %v6370_v47 = vld [vmem:[#allocation46_spill] sm:$0xff] }
 0x15d   : > { %v5382_v30 = vmul.f32 %v4804_v62, %v4804_v62  ;;  %v5386_v35 = vmul.f32 %v4808_v42, %v4808_v42  ;;  %v5390_v33 = vmul.f32 %v6280_v16, %v6280_v16  ;;  %v2080_v57 = vsel %vm1882_vm1, %v5145_v20, 0.0 }
 0x15e   : > { %v2081_v5 = vsel %vm1882_vm1, %v5149_v24, 0.0  ;;  %v1921_v29 = vadd.f32 %v6370_v47, %v1919_v14  ;;  %v5399_v62 = vmul.f32 %v4816_v45, %v4816_v45  ;;  %v5403_v42 = vmul.f32 %v4820_v59, %v4820_v59  ;;  %v6373_v45 = vld [vmem:[#allocation11_spill] sm:$0xff] }
 0x15f   : > { %6367 = vst [vmem:[#allocation66_spill] sm:$0xff] %v5382_v30  ;;  %6368 = vst [vmem:[#allocation67_spill] sm:$0xff] %v5386_v35  ;;  %v2082_v35 = vadd.f32 %v2081_v5, %v2080_v57  ;;  %v5407_v16 = vmul.f32 %v4824_v31, %v4824_v31  ;;  %v2083_v20 = vsel %vm1882_vm1, %v5154_v44, 0.0  ;;  %v2087_v14 = vsel %vm1882_vm1, %v5162_v61, 0.0  ;;  %v6374_v30 = vld [vmem:[#allocation96_spill] sm:$0xff]  ;;  %v6375_v5 = vld [vmem:[#allocation97_spill] sm:$0xff] }
 0x160   : > { %6369 = vst [vmem:[#allocation68_spill] sm:$0xff] %v5390_v33  ;;  %6371 = vst [vmem:[#allocation69_spill] sm:$0xff] %v5399_v62  ;;  %v6372_v33 = vld [vmem:[#allocation95_spill] sm:$0xff]  ;;  %v1923_v47 = vadd.f32 %v6373_v45, %v1921_v29  ;;  %v2089_v59 = vsel %vm1882_vm1, %v6374_v30, 0.0  ;;  %v2091_v57 = vsel %vm1882_vm1, %v5171_v60, 0.0  ;;  %v2093_v31 = vsel %vm1882_vm1, %v5175_v38, 0.0 }
 0x161   : > { %v2085_v24 = vsel %vm1882_vm1, %v6372_v33, 0.0  ;;  %v2084_v62 = vadd.f32 %v2083_v20, %v2082_v35  ;;  %v2095_v44 = vsel %vm1882_vm1, %v6375_v5, 0.0  ;;  %v2097_v33 = vsel %vm1882_vm1, %v5183_v56, 0.0  ;;  %v6376_v29 = vld [vmem:[#allocation47_spill] sm:$0xff]  ;;  %v6377_v45 = vld [vmem:[#allocation62_spill] sm:$0xff] }
 0x162   : > { %v2099_v61 = vsel %vm1882_vm1, %v5187_v50, 0.0  ;;  %v1925_v35 = vadd.f32 %v6376_v29, %v1923_v47  ;;  %v5431_v30 = vsel %vm1882_vm1, %v6377_v45, 0.0  ;;  %v5435_v60 = vsel %vm1882_vm1, %v5204_v21, 0.0 }
 0x163   : > { %v2086_v20 = vadd.f32 %v2085_v24, %v2084_v62  ;;  %v5439_v38 = vsel %vm1882_vm1, %v5208_v7, 0.0  ;;  %v5443_v56 = vsel %vm1882_vm1, %v5212_v58, 0.0  ;;  %v5447_v50 = vsel %vm1882_vm1, %v5216_v52, 0.0  ;;  %v6378_v24 = vld [vmem:[#allocation12_spill] sm:$0xff] }
 0x164   : > { %v5451_v62 = vsel %vm1882_vm1, %v5220_v9, 0.0  ;;  %v1927_v47 = vadd.f32 %v6378_v24, %v1925_v35  ;;  %v5456_v5 = vsel %vm1882_vm1, %v5224_v63, 0.0  ;;  %v5460_v7 = vsel %vm1882_vm1, %v5229_v1, 0.0 }
 0x165   : > { %v2088_v21 = vadd.f32 %v2087_v14, %v2086_v20  ;;  %v5464_v58 = vsel %vm1882_vm1, %v5233_v25, 0.0  ;;  %v5468_v52 = vsel %vm1882_vm1, %v5237_v3, 0.0  ;;  %v5472_v9 = vsel %vm1882_vm1, %v5241_v12, 0.0  ;;  %v6379_v14 = vld [vmem:[#allocation48_spill] sm:$0xff]  ;;  %v6380_v25 = vld [vmem:[#allocation65_spill] sm:$0xff] }
 0x166   : > { %v5476_v63 = vsel %vm1882_vm1, %v5245_v15, 0.0  ;;  %v1929_v29 = vadd.f32 %v6379_v14, %v1927_v47  ;;  %v5481_v35 = vsel %vm1882_vm1, %v5249_v0, 0.0  ;;  %v5485_v20 = vsel %vm1882_vm1, %v6380_v25, 0.0 }
 0x167   : > { %v2090_v1 = vadd.f32 %v2089_v59, %v2088_v21  ;;  %v5489_v3 = vsel %vm1882_vm1, %v5258_v2, 0.0  ;;  %v5493_v12 = vsel %vm1882_vm1, %v5262_v18, 0.0  ;;  %v5497_v15 = vsel %vm1882_vm1, %v5266_v49, 0.0  ;;  %v6381_v59 = vld [vmem:[#allocation13_spill] sm:$0xff] }
 0x168   : > { %v5501_v0 = vsel %vm1882_vm1, %v5270_v4, 0.0  ;;  %v1931_v45 = vadd.f32 %v6381_v59, %v1929_v29  ;;  %v5506_v47 = vsel %vm1882_vm1, %v5274_v17, 0.0  ;;  %v5510_v2 = vsel %vm1882_vm1, %v5278_v19, 0.0 }
 0x169   : > { %v2092_v24 = vadd.f32 %v2091_v57, %v2090_v1  ;;  %v5514_v18 = vsel %vm1882_vm1, %v5282_v26, 0.0  ;;  %v5518_v49 = vsel %vm1882_vm1, %v5287_v13, 0.0  ;;  %v5522_v4 = vsel %vm1882_vm1, %v5291_v22, 0.0  ;;  %v6382_v57 = vld [vmem:[#allocation14_spill] sm:$0xff] }
 0x16a   : > { %v5526_v17 = vsel %vm1882_vm1, %v5295_v23, 0.0  ;;  %v1933_v21 = vadd.f32 %v6382_v57, %v1931_v45  ;;  %v5531_v14 = vsel %vm1882_vm1, %v5299_v55, 0.0  ;;  %v5535_v26 = vsel %vm1882_vm1, %v5303_v36, 0.0 }
 0x16b   : > { %v2094_v19 = vadd.f32 %v2093_v31, %v2092_v24  ;;  %v5539_v13 = vsel %vm1882_vm1, %v5307_v32, 0.0  ;;  %v5543_v22 = vsel %vm1882_vm1, %v5311_v51, 0.0  ;;  %v5547_v23 = vsel %vm1882_vm1, %v5316_v43, 0.0  ;;  %v6383_v31 = vld [vmem:[#allocation33_spill] sm:$0xff] }
 0x16c   : > { %v5551_v55 = vsel %vm1882_vm1, %v5320_v34, 0.0  ;;  %v1935_v29 = vadd.f32 %v6383_v31, %v1933_v21  ;;  %v5556_v1 = vsel %vm1882_vm1, %v5324_v28, 0.0  ;;  %v5560_v32 = vsel %vm1882_vm1, %v5328_v6, 0.0  ;;  %v6394_v31 = vld [vmem:[#allocation94_spill] sm:$0xff] }
 0x16d   : > { %v2096_v36 = vadd.f32 %v2095_v44, %v2094_v19  ;;  %v5564_v51 = vsel %vm1882_vm1, %v5332_v37, 0.0  ;;  %v5568_v43 = vsel %vm1882_vm1, %v5336_v11, 0.0  ;;  %v5572_v34 = vsel %vm1882_vm1, %v5340_v41, 0.0  ;;  %v6384_v44 = vld [vmem:[#allocation34_spill] sm:$0xff] }
 0x16e   : > { %v5576_v28 = vsel %vm1882_vm1, %v5345_v48, 0.0  ;;  %v1937_v25 = vadd.f32 %v6384_v44, %v1935_v29  ;;  %v5581_v59 = vsel %vm1882_vm1, %v5349_v46, 0.0  ;;  %v5585_v37 = vsel %vm1882_vm1, %v5353_v40, 0.0 }
 0x16f   : > { %v2098_v6 = vadd.f32 %v2097_v33, %v2096_v36  ;;  %v5589_v11 = vsel %vm1882_vm1, %v5357_v54, 0.0  ;;  %v5593_v41 = vsel %vm1882_vm1, %v5361_v53, 0.0  ;;  %v5597_v48 = vsel %vm1882_vm1, %v5365_v39, 0.0  ;;  %v6385_v33 = vld [vmem:[#allocation35_spill] sm:$0xff]  ;;  %v6386_v53 = vld [vmem:[#allocation66_spill] sm:$0xff] }
 0x170   : > { %v5601_v46 = vsel %vm1882_vm1, %v5369_v8, 0.0  ;;  %v1939_v45 = vadd.f32 %v6385_v33, %v1937_v25  ;;  %v5606_v24 = vsel %vm1882_vm1, %v5374_v27, 0.0  ;;  %v5610_v54 = vsel %vm1882_vm1, %v5378_v10, 0.0  ;;  %v6388_v39 = vld [vmem:[#allocation67_spill] sm:$0xff]  ;;  %v6390_v8 = vld [vmem:[#allocation68_spill] sm:$0xff] }
 0x171   : > { %v2100_v40 = vadd.f32 %v2099_v61, %v2098_v6  ;;  %v5614_v57 = vsel %vm1882_vm1, %v6386_v53, 0.0  ;;  %v5618_v21 = vsel %vm1882_vm1, %v6388_v39, 0.0  ;;  %v5622_v19 = vsel %vm1882_vm1, %v6390_v8, 0.0  ;;  %v6392_v61 = vld [vmem:[#allocation69_spill] sm:$0xff]  ;;  %v6397_v25 = vld [vmem:[#allocation40_spill] sm:$0xff]  ;;  %v6399_v39 = vld [vmem:[#allocation63_spill] sm:$0xff] }
 0x172   : > { %6387 = vst [vmem:[#allocation70_spill] sm:$0xff] %v5614_v57  ;;  %6389 = vst [vmem:[#allocation71_spill] sm:$0xff] %v5618_v21  ;;  %v5626_v27 = vsel %vm1882_vm1, %v6392_v61, 0.0  ;;  %v1941_v29 = vadd.f32 %v6394_v31, %v1939_v45  ;;  %v5632_v36 = vsel %vm1882_vm1, %v5403_v42, 0.0  ;;  %v5636_v44 = vsel %vm1882_vm1, %v5407_v16, 0.0  ;;  %v6398_v33 = vld [vmem:[#allocation84_spill] sm:$0xff] }
 0x173   : > { %6391 = vst [vmem:[#allocation72_spill] sm:$0xff] %v5622_v19  ;;  %6393 = vst [vmem:[#allocation73_spill] sm:$0xff] %v5626_v27  ;;  %v2102_v10 = vadd.f32 %v5431_v30, %v2100_v40  ;;  %v1942_v6 = vsel %vm1882_vm1, %v6397_v25, 0.0  ;;  %v2030_v53 = vmul.f32 %v6398_v33, %v6398_v33  ;;  %v2103_v8 = vsel %vm1882_vm1, %v6399_v39, 0.0  ;;  %v6400_v30 = vld [vmem:[#allocation89_spill] sm:$0xff]  ;;  %v6401_v42 = vld [vmem:[#allocation64_spill] sm:$0xff] }
 0x174   : > { %6395 = vst [vmem:[#allocation90_spill] sm:$0xff] %v5632_v36  ;;  %6396 = vst [vmem:[#allocation42_spill] sm:$0xff] %v5636_v44  ;;  %v1943_v45 = vadd.f32 %v1942_v6, %v1941_v29  ;;  %v1944_v40 = vsel %vm1882_vm1, %v6400_v30, 0.0  ;;  %v2105_v31 = vsel %vm1882_vm1, %v6401_v42, 0.0  ;;  %v6402_v44 = vld [vmem:[#allocation41_spill] sm:$0xff]  ;;  %v6407_v42 = vld [vmem:[#allocation51_spill] sm:$0xff] }
 0x175   : > { %v2104_v61 = vadd.f32 %v2103_v8, %v2102_v10  ;;  %v1946_v27 = vsel %vm1882_vm1, %v6402_v44, 0.0  ;;  %v2107_v25 = vsel %vm1882_vm1, %v2030_v53, 0.0  ;;  %v6403_v21 = vld [vmem:[#allocation49_spill] sm:$0xff]  ;;  %v6404_v10 = vld [vmem:[#allocation15_spill] sm:$0xff]  ;;  %v6405_v8 = vld [vmem:[#allocation50_spill] sm:$0xff] }
 0x176   : > { %v1945_v36 = vadd.f32 %v1944_v40, %v1943_v45 }
 0x177   : > { %v2106_v16 = vadd.f32 %v2105_v31, %v2104_v61  ;;  %v6406_v61 = vld [vmem:[#allocation16_spill] sm:$0xff] }
 0x178   : > { %v1947_v19 = vadd.f32 %v1946_v27, %v1945_v36  ;;  %v6408_v36 = vld [vmem:[#allocation17_spill] sm:$0xff]  ;;  %v6410_v31 = vld [vmem:[#allocation52_spill] sm:$0xff] }
 0x179   : > { %v2108_v33 = vadd.f32 %v2107_v25, %v2106_v16  ;;  %v6411_v25 = vld [vmem:[#allocation19_spill] sm:$0xff] }
 0x17a   : > { %v1949_v57 = vadd.f32 %v6403_v21, %v1947_v19  ;;  %v6409_v19 = vld [vmem:[#allocation18_spill] sm:$0xff] }
 0x17b   : > { %v2110_v29 = vadd.f32 %v5435_v60, %v2108_v33 }
 0x17c   : > { %v1951_v6 = vadd.f32 %v6404_v10, %v1949_v57 }
 0x17d   : > { %v2112_v39 = vadd.f32 %v5439_v38, %v2110_v29  ;;  %v6412_v29 = vld [vmem:[#allocation53_spill] sm:$0xff] }
 0x17e   : > { %v1953_v30 = vadd.f32 %v6405_v8, %v1951_v6  ;;  %v6413_v6 = vld [vmem:[#allocation20_spill] sm:$0xff]  ;;  %v6414_v8 = vld [vmem:[#allocation54_spill] sm:$0xff] }
 0x17f   : > { %v2114_v45 = vadd.f32 %v5443_v56, %v2112_v39 }
 0x180   : > { %v1955_v40 = vadd.f32 %v6406_v61, %v1953_v30 }
 0x181   : > { %v2116_v44 = vadd.f32 %v5447_v50, %v2114_v45  ;;  %v6415_v45 = vld [vmem:[#allocation21_spill] sm:$0xff] }
 0x182   : > { %v1957_v53 = vadd.f32 %v6407_v42, %v1955_v40  ;;  %v6416_v40 = vld [vmem:[#allocation22_spill] sm:$0xff]  ;;  %v6417_v42 = vld [vmem:[#allocation55_spill] sm:$0xff] }
 0x183   : > { %v2118_v27 = vadd.f32 %v5451_v62, %v2116_v44 }
 0x184   : > { %v1959_v21 = vadd.f32 %v6408_v36, %v1957_v53 }
 0x185   : > { %v2120_v60 = vadd.f32 %v5456_v5, %v2118_v27  ;;  %v6418_v27 = vld [vmem:[#allocation23_spill] sm:$0xff] }
 0x186   : > { %v1961_v57 = vadd.f32 %v6409_v19, %v1959_v21  ;;  %v6419_v21 = vld [vmem:[#allocation56_spill] sm:$0xff] }
 0x187   : > { %v2122_v38 = vadd.f32 %v5460_v7, %v2120_v60  ;;  %v6420_v19 = vld [vmem:[#allocation24_spill] sm:$0xff] }
 0x188   : > { %v1963_v16 = vadd.f32 %v6410_v31, %v1961_v57 }
 0x189   : > { %v2124_v56 = vadd.f32 %v5464_v58, %v2122_v38  ;;  %v6421_v38 = vld [vmem:[#allocation57_spill] sm:$0xff] }
 0x18a   : > { %v1965_v33 = vadd.f32 %v6411_v25, %v1963_v16  ;;  %v6422_v16 = vld [vmem:[#allocation25_spill] sm:$0xff]  ;;  %v6423_v25 = vld [vmem:[#allocation26_spill] sm:$0xff] }
 0x18b   : > { %v2126_v50 = vadd.f32 %v5468_v52, %v2124_v56 }
 0x18c   : > { %v1967_v10 = vadd.f32 %v6412_v29, %v1965_v33 }
 0x18d   : > { %v2128_v62 = vadd.f32 %v5472_v9, %v2126_v50  ;;  %v6424_v50 = vld [vmem:[#allocation58_spill] sm:$0xff] }
 0x18e   : > { %v1969_v39 = vadd.f32 %v6413_v6, %v1967_v10  ;;  %v6425_v10 = vld [vmem:[#allocation27_spill] sm:$0xff] }
 0x18f   : > { %v2130_v5 = vadd.f32 %v5476_v63, %v2128_v62  ;;  %v6426_v6 = vld [vmem:[#allocation59_spill] sm:$0xff] }
 0x190   : > { %v1971_v30 = vadd.f32 %v6414_v8, %v1969_v39 }
 0x191   : > { %v2132_v7 = vadd.f32 %v5481_v35, %v2130_v5  ;;  %v6427_v5 = vld [vmem:[#allocation28_spill] sm:$0xff] }
 0x192   : > { %v1973_v61 = vadd.f32 %v6415_v45, %v1971_v30  ;;  %v6428_v30 = vld [vmem:[#allocation60_spill] sm:$0xff]  ;;  %v6429_v45 = vld [vmem:[#allocation29_spill] sm:$0xff] }
 0x193   : > { %v2134_v58 = vadd.f32 %v5485_v20, %v2132_v7 }
 0x194   : > { %v1975_v44 = vadd.f32 %v6416_v40, %v1973_v61 }
 0x195   : > { %v2136_v52 = vadd.f32 %v5489_v3, %v2134_v58  ;;  %v6430_v58 = vld [vmem:[#allocation61_spill] sm:$0xff] }
 0x196   : > { %v1977_v53 = vadd.f32 %v6417_v42, %v1975_v44  ;;  %v6431_v44 = vld [vmem:[#allocation30_spill] sm:$0xff]  ;;  %v6432_v42 = vld [vmem:[#allocation31_spill] sm:$0xff] }
 0x197   : > { %v2138_v9 = vadd.f32 %v5493_v12, %v2136_v52 }
 0x198   : > { %v1979_v36 = vadd.f32 %v6418_v27, %v1977_v53 }
 0x199   : > { %v2140_v63 = vadd.f32 %v5497_v15, %v2138_v9  ;;  %v6433_v9 = vld [vmem:[#allocation32_spill] sm:$0xff] }
 0x19a   : > { %v1981_v60 = vadd.f32 %v6419_v21, %v1979_v36 }
 0x19b   : > { %v2142_v35 = vadd.f32 %v5501_v0, %v2140_v63 }
 0x19c   : > { %v1983_v57 = vadd.f32 %v6420_v19, %v1981_v60 }
 0x19d   : > { %v2144_v20 = vadd.f32 %v5506_v47, %v2142_v35 }
 0x19e   : > { %v1985_v31 = vadd.f32 %v6421_v38, %v1983_v57  ;;  %v6438_v38 = vld [vmem:[#allocation90_spill] sm:$0xff] }
 0x19f   : > { %v2146_v3 = vadd.f32 %v5510_v2, %v2144_v20  ;;  %v6437_v20 = vld [vmem:[#allocation73_spill] sm:$0xff] }
 0x1a0   : > { %v1987_v56 = vadd.f32 %v6422_v16, %v1985_v31  ;;  %v6439_v31 = vld [vmem:[#allocation42_spill] sm:$0xff] }
 0x1a1   : > { %v2148_v12 = vadd.f32 %v5514_v18, %v2146_v3 }
 0x1a2   : > { %v1989_v33 = vadd.f32 %v6423_v25, %v1987_v56 }
 0x1a3   : > { %v2150_v15 = vadd.f32 %v5518_v49, %v2148_v12 }
 0x1a4   : > { %v1991_v29 = vadd.f32 %v6424_v50, %v1989_v33 }
 0x1a5   : > { %v2152_v0 = vadd.f32 %v5522_v4, %v2150_v15 }
 0x1a6   : > { %v1993_v62 = vadd.f32 %v6425_v10, %v1991_v29 }
 0x1a7   : > { %v2154_v47 = vadd.f32 %v5526_v17, %v2152_v0 }
 0x1a8   : > { %v1995_v39 = vadd.f32 %v6426_v6, %v1993_v62 }
 0x1a9   : > { %v2156_v2 = vadd.f32 %v5531_v14, %v2154_v47 }
 0x1aa   : > { %v1997_v8 = vadd.f32 %v6427_v5, %v1995_v39 }
 0x1ab   : > { %v2158_v18 = vadd.f32 %v5535_v26, %v2156_v2 }
 0x1ac   : > { %v1999_v7 = vadd.f32 %v6428_v30, %v1997_v8 }
 0x1ad   : > { %v2160_v49 = vadd.f32 %v5539_v13, %v2158_v18 }
 0x1ae   : > { %v2001_v61 = vadd.f32 %v6429_v45, %v1999_v7 }
 0x1af   : > { %v2162_v4 = vadd.f32 %v5543_v22, %v2160_v49 }
 0x1b0   : > { %v2003_v40 = vadd.f32 %v6430_v58, %v2001_v61 }
 0x1b1   : > { %v2164_v17 = vadd.f32 %v5547_v23, %v2162_v4 }
 0x1b2   : > { %v2005_v52 = vadd.f32 %v6431_v44, %v2003_v40 }
 0x1b3   : > { %v2166_v14 = vadd.f32 %v5551_v55, %v2164_v17 }
 0x1b4   : > { %v2007_v53 = vadd.f32 %v6432_v42, %v2005_v52 }
 0x1b5   : > { %v2168_v26 = vadd.f32 %v5556_v1, %v2166_v14 }
 0x1b6   : > { %v2009_v27 = vadd.f32 %v6433_v9, %v2007_v53 }
 0x1b7   : > { %v2170_v13 = vadd.f32 %v5560_v32, %v2168_v26 }
 0x1b8   : > { %2010 = vadd.xlane.f32.xlu1 %v2009_v27 }
 0x1b9   : > { %v2172_v36 = vadd.f32 %v5564_v51, %v2170_v13 }
 0x1bb   : > { %v2174_v22 = vadd.f32 %v5568_v43, %v2172_v36 }
 0x1bd   : > { %v2176_v63 = vadd.f32 %v5572_v34, %v2174_v22 }
 0x1bf   : > { %v2178_v23 = vadd.f32 %v5576_v28, %v2176_v63  ;;  %v6434_v28 = vld [vmem:[#allocation70_spill] sm:$0xff] }
 0x1c1   : > { %v2180_v55 = vadd.f32 %v5581_v59, %v2178_v23  ;;  %v6435_v59 = vld [vmem:[#allocation71_spill] sm:$0xff] }
 0x1c3   : > { %v2182_v21 = vadd.f32 %v5585_v37, %v2180_v55  ;;  %v6436_v37 = vld [vmem:[#allocation72_spill] sm:$0xff] }
 0x1c5   : > { %v2184_v1 = vadd.f32 %v5589_v11, %v2182_v21 }
 0x1c7   : > { %v2186_v60 = vadd.f32 %v5593_v41, %v2184_v1 }
 0x1c9   : > { %v2188_v32 = vadd.f32 %v5597_v48, %v2186_v60 }
 0x1cb   : > { %v2190_v51 = vadd.f32 %v5601_v46, %v2188_v32 }
 0x1cd   : > { %v2192_v43 = vadd.f32 %v5606_v24, %v2190_v51 }
 0x1cf   : > { %v2194_v34 = vadd.f32 %v5610_v54, %v2192_v43 }
 0x1d1   : > { %v2196_v35 = vadd.f32 %v6434_v28, %v2194_v34 }
 0x1d3   : > { %v2198_v19 = vadd.f32 %v6435_v59, %v2196_v35 }
 0x1d5   : > { %v2200_v57 = vadd.f32 %v6436_v37, %v2198_v19 }
 0x1d7   : > { %v2202_v11 = vadd.f32 %v6437_v20, %v2200_v57 }
 0x1d9   : > { %v2204_v41 = vadd.f32 %v6438_v38, %v2202_v11 }
 0x1db   : > { %v2206_v3 = vadd.f32 %v6439_v31, %v2204_v41 }
 0x1dd   : > { %2207 = vadd.xlane.f32.xlu0 %v2206_v3 }
 0x1de   : > { %2455 = shalt.err (!%p2452_p4)
}
 0x1df   : > { %s2456_s21 = scalar_lea.hbm %s5735_s28, 4096  ;;  %s2460_s9 = scalar_lea.hbm %s5794_s3, 8192 }
 0x1e0   : > { %p2457_p10 = scmp.ne.s32.totalorder %s5735_s28, %s2456_s21  ;;  %p2461_p2 = scmp.lt.u32.totalorder %s5735_s28, %s5794_s3 }
 0x1e1   : > { %p2462_p5 = scmp.lt.u32.totalorder %s2460_s9, %s2456_s21  ;;  %p2464_p8 = scmp.lt.u32.totalorder %s2456_s21, %s5735_s28 }
 0x1e2   : > { %p2458_p12 = pnand %p2457_p10, %p6440_p11 }
 0x1e3   : > { %p2463_p9 = por %p2462_p5, %p2461_p2 }
 0x1e4   : > { %p2459_p1 = pneg %p2458_p12 }
 0x1e5   : > { %p2465_p0 = por %p2464_p8, %p2463_p9 }
 0x1e7   : > { %p2466_p7 = pnand %p2465_p0, %p2459_p1 }
 0x1e9   : > { %2469 = shalt.err (!%p2466_p7)
}
 0x1ea   : > { %2345 = dma.vmem_to_hbm [thread:$0]  (%p6440_p11), %s2229_s14, 4096, %s5735_s28, %s2212_s17   ;;  %v1881_v48 = vld [vmem:[%s5795_s4] sm:$0xf]  ;;  %vm2013_vm2 = vcmask 3072  }
 0x1eb   : > { %v2015_v54 = vld [vmem:[%s5796_s5] sm:$0xf] }
 0x245   : > { %v2011_v46 = vpop.xlane.xlu1 %2010 }
 0x246   : > { %v2012_v24 = vadd.f32 %v2011_v46, %v1881_v48 }
 0x248   : > { %2014 = vst.msk [vmem:[%s5795_s4] sm:$0xf] %vm2013_vm2, %v2012_v24 }
 0x26a   : > { %v2208_v16 = vpop.xlane.xlu0 %2207 }
 0x26b   : > { %v2209_v56 = vadd.f32 %v2208_v16, %v2015_v54 }
 0x26d   : > { %2210 = vst.msk [vmem:[%s5796_s5] sm:$0xf] %vm2013_vm2, %v2209_v56 }
 0x26e PF: > { %s2252_s28 = sand.u32 1, %s2504_s18   ;;  %p6441_p11 = scmp.ne.s32.totalorder %s5842_s8, 0 }
 0x26f   : > { %p6442_p13 = scmp.ge.s32.totalorder %s2524_s23, 2  ;;  %s2253_s14 = scalar_lea.sflag [#allocation4], %s2252_s28 }
 0x271   : > { %p2352_p3 = pnand %p6442_p13, %p6441_p11 }
 0x273   : > { %2499 = dma.done.wait (!%p2352_p3), %s2253_s14, 4096  }
 0x274   : > { %2501 = vsyncadd (!%p2352_p3), %s2253_s14, 4294963200  ;;  %s22_s23 = sadd.s32 1, %s2524_s23   ;;  %s6443_s18 = smov %s2508_s19 }
 0x275   : > { %p19_p6 = scmp.ge.s32.totalorder %s22_s23, 4   ;;  %s6444_s19 = smov %s2512_s20 }
 0x276   : > { %s6445_s20 = smov %s2617_s7  ;;  %s6446_s21 = smov %s2520_s22 }
 0x277   : > { %s6447_s22 = smov %s6449_s26  ;;  %21 = sbr.rel (!%p19_p6) target bundleno = 6 (0x6), region = 97 }
 0x27e   :  { %2258 = vsyncpa [#allocation3], 1 }
 0x27f   :  { %2260 = vsyncpa [#allocation3 + $0x1], 1 }
 0x280   :  { %2261 = vsyncpa [#allocation4], 1 }
 0x281   :  { %2263 = vsyncpa [#allocation4 + $0x1], 1 }

</bundles_post_ra>
